<compile_context>
chip_gen: v5e
topology: v5e:2x2
jax: 0.10.0
libtpu: 0.0.40
codegen_flags: <defaults>
</compile_context>

<pallas_src>
import jax
import jax.numpy as jnp
from jax.experimental import pallas as pl
from jax.experimental.pallas import tpu as pltpu

LANES = 128
_VMEM_LIMIT = 32 * 1024 * 1024  # safe on v5e/v6e/v7x


def _round_up(x, m):
    return ((x + m - 1) // m) * m


# ----------------------------- Pallas kernels ------------------------------

def _conv_pool_kernel(cols_ref, w_ref, b_ref, o_ref):
    """Fused conv (as matmul) + 2x2 maxpool + bias + ReLU.

    cols_ref: (4, tile_m, K)  -- the 4 pooling phases of the im2col rows
    w_ref:    (K, 128)        -- lane-padded conv weight (resident across grid)
    b_ref:    (1, 128)
    o_ref:    (tile_m, 128)   -- pooled activation, lane-dense
    """
    p, tm, k = cols_ref.shape
    # Single MXU matmul over all 4 phases (one weight push instead of 4).
    x = cols_ref[...].reshape(p * tm, k)
    y = jnp.dot(x, w_ref[...], preferred_element_type=jnp.float32)
    y = y.reshape(p, tm, o_ref.shape[-1])
    # 2x2 maxpool == max over the 4 phases; bias/ReLU hoisted after the max
    # (valid because ReLU is monotone and the bias is phase-invariant).
    y = jnp.max(y, axis=0)
    o_ref[...] = jnp.maximum(y + b_ref[...], 0.0).astype(o_ref.dtype)


def _fc_stack_kernel(x_ref, w1_ref, b1_ref, w2_ref, b2_ref, w3_ref, b3_ref, o_ref):
    """Fused fc1+ReLU -> fc2+ReLU -> fc3, all weights resident in VMEM."""
    h = jnp.dot(x_ref[...], w1_ref[...], preferred_element_type=jnp.float32) + b1_ref[...]
    h = jnp.maximum(h, 0.0)
    h = jnp.dot(h, w2_ref[...], preferred_element_type=jnp.float32) + b2_ref[...]
    h = jnp.maximum(h, 0.0)
    o = jnp.dot(h, w3_ref[...], preferred_element_type=jnp.float32) + b3_ref[...]
    o_ref[...] = o.astype(o_ref.dtype)


# --------------------------- Pallas call wrappers ---------------------------

def conv_pool_matmul(cols4, w, b, *, tile_m=512):
    """cols4: (4, M, K) f32; w: (K, 128); b: (1, 128) -> (M, 128) pooled output."""
    _, M, K = cols4.shape
    tile_m = min(tile_m, _round_up(M, 8))
    m_pad = _round_up(M, tile_m)
    if m_pad != M:
        cols4 = jnp.pad(cols4, ((0, 0), (0, m_pad - M), (0, 0)))
    grid = (m_pad // tile_m,)
    out = pl.pallas_call(
        _conv_pool_kernel,
        out_shape=jax.ShapeDtypeStruct((m_pad, LANES), jnp.float32),
        grid=grid,
        in_specs=[
            pl.BlockSpec((4, tile_m, K), lambda i: (0, i, 0)),
            pl.BlockSpec((K, LANES), lambda i: (0, 0)),     # resident weight
            pl.BlockSpec((1, LANES), lambda i: (0, 0)),     # resident bias
        ],
        out_specs=pl.BlockSpec((tile_m, LANES), lambda i: (i, 0)),
        compiler_params=pltpu.CompilerParams(
            dimension_semantics=("parallel",),
            vmem_limit_bytes=_VMEM_LIMIT),
    )(cols4, w, b)
    return out[:M]


def fc_stack(x, p, *, tile_m=512):
    """x: (M, 400) -> (M, 128) logits (lane-padded), fc1/fc2/fc3 fused."""
    M, K = x.shape
    tile_m = min(tile_m, _round_up(M, 8))
    m_pad = _round_up(M, tile_m)
    if m_pad != M:
        x = jnp.pad(x, ((0, m_pad - M), (0, 0)))
    grid = (m_pad // tile_m,)
    out = pl.pallas_call(
        _fc_stack_kernel,
        out_shape=jax.ShapeDtypeStruct((m_pad, LANES), jnp.float32),
        grid=grid,
        in_specs=[
            pl.BlockSpec((tile_m, K), lambda i: (i, 0)),
            pl.BlockSpec((K, LANES), lambda i: (0, 0)),
            pl.BlockSpec((1, LANES), lambda i: (0, 0)),
            pl.BlockSpec((LANES, LANES), lambda i: (0, 0)),
            pl.BlockSpec((1, LANES), lambda i: (0, 0)),
            pl.BlockSpec((LANES, LANES), lambda i: (0, 0)),
            pl.BlockSpec((1, LANES), lambda i: (0, 0)),
        ],
        out_specs=pl.BlockSpec((tile_m, LANES), lambda i: (i, 0)),
        compiler_params=pltpu.CompilerParams(
            dimension_semantics=("parallel",),
            vmem_limit_bytes=_VMEM_LIMIT),
    )(x, p["fc1_w"], p["fc1_b"], p["fc2_w"], p["fc2_b"], p["fc3_w"], p["fc3_b"])
    return out[:M]


# ------------------------------ JAX glue -----------------------------------

def _im2col_pool_phases(x_nhwc, k):
    """Valid, stride-1 im2col, with rows grouped into the 4 (2x2, stride-2)
    pooling phases.  Returns (4, N*Hp*Wp, k*k*C) with patch order (kh, kw, cin)
    and row order (n, p, q).  Any odd conv-output row/col is dropped, matching
    nn.MaxPool2d(2, 2) floor behaviour."""
    N, H, W, C = x_nhwc.shape
    Ho, Wo = H - k + 1, W - k + 1
    Hp, Wp = Ho // 2, Wo // 2
    patches = [x_nhwc[:, di:di + Ho, dj:dj + Wo, :]
               for di in range(k) for dj in range(k)]
    cols = jnp.stack(patches, axis=3)                       # (N, Ho, Wo, k*k, C)
    cols = cols.reshape(N, Ho, Wo, k * k * C)
    cols = cols[:, :2 * Hp, :2 * Wp, :]
    cols = cols.reshape(N, Hp, 2, Wp, 2, k * k * C)
    cols = jnp.transpose(cols, (2, 4, 0, 1, 3, 5))          # (a, b, N, Hp, Wp, K)
    return cols.reshape(4, N * Hp * Wp, k * k * C), (N, Hp, Wp)


def _pad_last(x, k_pad):
    k = x.shape[-1]
    if k_pad == k:
        return x
    return jnp.pad(x, ((0, 0),) * (x.ndim - 1) + ((0, k_pad - k),))


def init_lenet_params(key, in_dims=1, out_dims=10):
    """Deterministic synthetic init (PyTorch-style uniform(-1/sqrt(fan_in), ...))."""
    keys = jax.random.split(key, 10)

    def u(k, shape, fan_in):
        bound = 1.0 / jnp.sqrt(jnp.float32(fan_in))
        return jax.random.uniform(k, shape, jnp.float32, -bound, bound)

    return dict(
        conv1_w=u(keys[0], (6, in_dims, 5, 5), in_dims * 25),
        conv1_b=u(keys[1], (6,), in_dims * 25),
        conv2_w=u(keys[2], (16, 6, 5, 5), 6 * 25),
        conv2_b=u(keys[3], (16,), 6 * 25),
        fc1_w=u(keys[4], (120, 5 * 5 * 16), 400),
        fc1_b=u(keys[5], (120,), 400),
        fc2_w=u(keys[6], (84, 120), 120),
        fc2_b=u(keys[7], (84,), 120),
        fc3_w=u(keys[8], (out_dims, 84), 84),
        fc3_b=u(keys[9], (out_dims,), 84),
    )


def pack_lenet_params(params):
    """One-time (outside jit) repacking of PyTorch-layout weights into
    lane-padded (K, 128) matrices and (1, 128) biases, with K padded to a
    multiple of 8 via zero rows."""
    f32 = jnp.float32

    def pack_conv(w, b):
        c_out, c_in, kh, kw = w.shape
        K = kh * kw * c_in
        k_pad = _round_up(K, 8)
        wm = jnp.transpose(w, (2, 3, 1, 0)).reshape(K, c_out).astype(f32)  # (kh,kw,cin)->cout
        wp = jnp.zeros((k_pad, LANES), f32).at[:K, :c_out].set(wm)
        bp = jnp.zeros((1, LANES), f32).at[0, :c_out].set(b.astype(f32))
        return wp, bp

    w1, b1 = pack_conv(params["conv1_w"], params["conv1_b"])
    w2, b2 = pack_conv(params["conv2_w"], params["conv2_b"])

    # fc1: PyTorch flattens NCHW -> input index c*25 + h*5 + w.  Our pooled
    # activation is flattened as (h, w, c) with c in [0, 16); fold the
    # permutation into the weight rows so the kernel needs no transpose.
    fw1 = params["fc1_w"].astype(f32)                       # (120, 400)
    fw1 = fw1.reshape(120, 16, 5, 5)                        # (o, c, h, w)
    fw1 = jnp.transpose(fw1, (2, 3, 1, 0)).reshape(400, 120)  # row = h*80 + w*16 + c
    wf1 = jnp.zeros((400, LANES), f32).at[:, :120].set(fw1)
    bf1 = jnp.zeros((1, LANES), f32).at[0, :120].set(params["fc1_b"].astype(f32))

    def pack_fc(w, b):
        d_out, d_in = w.shape
        wp = jnp.zeros((LANES, LANES), f32).at[:d_in, :d_out].set(w.T.astype(f32))
        bp = jnp.zeros((1, LANES), f32).at[0, :d_out].set(b.astype(f32))
        return wp, bp

    wf2, bf2 = pack_fc(params["fc2_w"], params["fc2_b"])
    wf3, bf3 = pack_fc(params["fc3_w"], params["fc3_b"])

    return dict(conv1_w=w1, conv1_b=b1, conv2_w=w2, conv2_b=b2,
                fc1_w=wf1, fc1_b=bf1, fc2_w=wf2, fc2_b=bf2,
                fc3_w=wf3, fc3_b=bf3)


def mcmc_lenet_forward(packed, x_nchw, *, out_dims=10):
    """Forward pass of mcmcLeNet: (conv-relu-pool) x2, fc1-relu, fc2-relu, fc3."""
    x = jnp.transpose(x_nchw, (0, 2, 3, 1)).astype(jnp.float32)      # NCHW -> NHWC

    # conv1 + relu + pool1 (fused kernel)
    cols1, (N, H1, W1) = _im2col_pool_phases(x, 5)                   # (4, N*14*14, 25)
    cols1 = _pad_last(cols1, packed["conv1_w"].shape[0])             # K: 25 -> 32
    a1 = conv_pool_matmul(cols1, packed["conv1_w"], packed["conv1_b"])
    a1 = a1.reshape(N, H1, W1, LANES)[..., :6]                       # (N,14,14,6)

    # conv2 + relu + pool2 (fused kernel)
    cols2, (N, H2, W2) = _im2col_pool_phases(a1, 5)                  # (4, N*5*5, 150)
    cols2 = _pad_last(cols2, packed["conv2_w"].shape[0])             # K: 150 -> 152
    a2 = conv_pool_matmul(cols2, packed["conv2_w"], packed["conv2_b"])
    a2 = a2.reshape(N, H2, W2, LANES)[..., :16].reshape(N, H2 * W2 * 16)  # (N,400) in (h,w,c)

    # fc1 -> fc2 -> fc3 (single fused kernel; PyTorch flatten order absorbed
    # into the pre-packed fc1 weight rows)
    logits = fc_stack(a2, packed)                                    # (N,128)
    return logits[:, :out_dims]


if __name__ == "__main__":
    key = jax.random.PRNGKey(0)
    k_x, k_p = jax.random.split(key)
    # LeNet geometry (fc1 in = 5*5*16) implies 32x32 single-channel inputs.
    x = jax.random.normal(k_x, (2, 1, 32, 32), dtype=jnp.float32)
    params = init_lenet_params(k_p, in_dims=1, out_dims=10)
    packed = pack_lenet_params(params)   # hoisted: done once, outside jit

    fwd = jax.jit(mcmc_lenet_forward, static_argnames=("out_dims",))
    out = fwd(packed, x, out_dims=10)
    out = jax.block_until_ready(out)
    assert out.shape == (2, 10) and out.dtype == jnp.float32
    print("KERNEL_OK")
</pallas_src>

<mosaic_0001>
module attributes {stable_mosaic.version = 11 : i64} {
  func.func @_conv_pool_kernel(%arg0: i32, %arg1: memref<4x392x32xf32, #tpu.memory_space<vmem>>, %arg2: memref<32x128xf32, #tpu.memory_space<vmem>>, %arg3: memref<1x128xf32, #tpu.memory_space<vmem>>, %arg4: memref<392x128xf32, #tpu.memory_space<vmem>>) attributes {dimension_semantics = [#tpu.dimension_semantics<parallel>], iteration_bounds = array<i64: 1>, scalar_prefetch = 0 : i64, scratch_operands = 0 : i64, tpu.core_type = #tpu.core_type<tc>, window_params = [{transform_indices = @transform_0, window_bounds = array<i64: 4, 392, 32>}, {pipeline_mode = #tpu.pipeline_mode<synchronous>, transform_indices = @transform_1, window_bounds = array<i64: 32, 128>}, {pipeline_mode = #tpu.pipeline_mode<synchronous>, transform_indices = @transform_2, window_bounds = array<i64: 1, 128>}, {transform_indices = @transform_3, window_bounds = array<i64: 392, 128>}]} {
    %c0 = arith.constant 0 : index
    %c0_0 = arith.constant 0 : index
    %c0_1 = arith.constant 0 : index
    %0 = vector.load %arg1[%c0, %c0_0, %c0_1] : memref<4x392x32xf32, #tpu.memory_space<vmem>>, vector<4x392x32xf32>
    %1 = vector.shape_cast %0 : vector<4x392x32xf32> to vector<1568x32xf32>
    %c0_2 = arith.constant 0 : index
    %c0_3 = arith.constant 0 : index
    %2 = vector.load %arg2[%c0_2, %c0_3] : memref<32x128xf32, #tpu.memory_space<vmem>>, vector<32x128xf32>
    %cst = arith.constant dense<0.000000e+00> : vector<1568x128xf32>
    %3 = tpu.matmul %1, %2, %cst {dimension_numbers = #tpu.dot_dimension_numbers<[1], [0], [0], [1], [0, 0, 1, 1], [], []>} : vector<1568x32xf32>, vector<32x128xf32>, vector<1568x128xf32> -> vector<1568x128xf32>
    %4 = vector.shape_cast %3 : vector<1568x128xf32> to vector<4x392x128xf32>
    %cst_4 = arith.constant dense<0xFF800000> : vector<392x128xf32>
    %5 = vector.multi_reduction <maximumf>, %4, %cst_4 [0] : vector<4x392x128xf32> to vector<392x128xf32>
    %c0_5 = arith.constant 0 : index
    %c0_6 = arith.constant 0 : index
    %6 = vector.load %arg3[%c0_5, %c0_6] : memref<1x128xf32, #tpu.memory_space<vmem>>, vector<1x128xf32>
    %7 = vector.broadcast %6 : vector<1x128xf32> to vector<392x128xf32>
    %8 = arith.addf %5, %7 : vector<392x128xf32>
    %cst_7 = arith.constant 0.000000e+00 : f32
    %9 = vector.broadcast %cst_7 : f32 to vector<392x128xf32>
    %10 = arith.maximumf %8, %9 : vector<392x128xf32>
    %c0_8 = arith.constant 0 : index
    %c0_9 = arith.constant 0 : index
    %11 = vector.load %arg4[%c0_8, %c0_9] : memref<392x128xf32, #tpu.memory_space<vmem>>, vector<392x128xf32>
    tpu.vector_store %arg4[%c0_8, %c0_9], %10 {strides = array<i32>} : memref<392x128xf32, #tpu.memory_space<vmem>>, vector<392x128xf32>,
    return
  }
  func.func @transform_0(%arg0: i32) -> (i32, i32, i32) {
    %c0_i32 = arith.constant 0 : i32
    %c0_i32_0 = arith.constant 0 : i32
    %c0_i32_1 = arith.constant 0 : i32
    return %c0_i32, %arg0, %c0_i32_0 : i32, i32, i32
  }
  func.func @transform_1(%arg0: i32) -> (i32, i32) {
    %c0_i32 = arith.constant 0 : i32
    %c0_i32_0 = arith.constant 0 : i32
    %c0_i32_1 = arith.constant 0 : i32
    return %c0_i32, %c0_i32_0 : i32, i32
  }
  func.func @transform_2(%arg0: i32) -> (i32, i32) {
    %c0_i32 = arith.constant 0 : i32
    %c0_i32_0 = arith.constant 0 : i32
    %c0_i32_1 = arith.constant 0 : i32
    return %c0_i32, %c0_i32_0 : i32, i32
  }
  func.func @transform_3(%arg0: i32) -> (i32, i32) {
    %c0_i32 = arith.constant 0 : i32
    %c0_i32_0 = arith.constant 0 : i32
    return %arg0, %c0_i32 : i32, i32
  }
}

module attributes {stable_mosaic.version = 11 : i64} {
  func.func @_conv_pool_kernel(%arg0: i32, %arg1: memref<4x56x152xf32, #tpu.memory_space<vmem>>, %arg2: memref<152x128xf32, #tpu.memory_space<vmem>>, %arg3: memref<1x128xf32, #tpu.memory_space<vmem>>, %arg4: memref<56x128xf32, #tpu.memory_space<vmem>>) attributes {dimension_semantics = [#tpu.dimension_semantics<parallel>], iteration_bounds = array<i64: 1>, scalar_prefetch = 0 : i64, scratch_operands = 0 : i64, tpu.core_type = #tpu.core_type<tc>, window_params = [{transform_indices = @transform_0, window_bounds = array<i64: 4, 56, 152>}, {pipeline_mode = #tpu.pipeline_mode<synchronous>, transform_indices = @transform_1, window_bounds = array<i64: 152, 128>}, {pipeline_mode = #tpu.pipeline_mode<synchronous>, transform_indices = @transform_2, window_bounds = array<i64: 1, 128>}, {transform_indices = @transform_3, window_bounds = array<i64: 56, 128>}]} {
    %c0 = arith.constant 0 : index
    %c0_0 = arith.constant 0 : index
    %c0_1 = arith.constant 0 : index
    %0 = vector.load %arg1[%c0, %c0_0, %c0_1] : memref<4x56x152xf32, #tpu.memory_space<vmem>>, vector<4x56x152xf32>
    %1 = vector.shape_cast %0 : vector<4x56x152xf32> to vector<224x152xf32>
    %c0_2 = arith.constant 0 : index
    %c0_3 = arith.constant 0 : index
    %2 = vector.load %arg2[%c0_2, %c0_3] : memref<152x128xf32, #tpu.memory_space<vmem>>, vector<152x128xf32>
    %cst = arith.constant dense<0.000000e+00> : vector<224x128xf32>
    %3 = tpu.matmul %1, %2, %cst {dimension_numbers = #tpu.dot_dimension_numbers<[1], [0], [0], [1], [0, 0, 1, 1], [], []>} : vector<224x152xf32>, vector<152x128xf32>, vector<224x128xf32> -> vector<224x128xf32>
    %4 = vector.shape_cast %3 : vector<224x128xf32> to vector<4x56x128xf32>
    %cst_4 = arith.constant dense<0xFF800000> : vector<56x128xf32>
    %5 = vector.multi_reduction <maximumf>, %4, %cst_4 [0] : vector<4x56x128xf32> to vector<56x128xf32>
    %c0_5 = arith.constant 0 : index
    %c0_6 = arith.constant 0 : index
    %6 = vector.load %arg3[%c0_5, %c0_6] : memref<1x128xf32, #tpu.memory_space<vmem>>, vector<1x128xf32>
    %7 = vector.broadcast %6 : vector<1x128xf32> to vector<56x128xf32>
    %8 = arith.addf %5, %7 : vector<56x128xf32>
    %cst_7 = arith.constant 0.000000e+00 : f32
    %9 = vector.broadcast %cst_7 : f32 to vector<56x128xf32>
    %10 = arith.maximumf %8, %9 : vector<56x128xf32>
    %c0_8 = arith.constant 0 : index
    %c0_9 = arith.constant 0 : index
    %11 = vector.load %arg4[%c0_8, %c0_9] : memref<56x128xf32, #tpu.memory_space<vmem>>, vector<56x128xf32>
    tpu.vector_store %arg4[%c0_8, %c0_9], %10 {strides = array<i32>} : memref<56x128xf32, #tpu.memory_space<vmem>>, vector<56x128xf32>,
    return
  }
  func.func @transform_0(%arg0: i32) -> (i32, i32, i32) {
    %c0_i32 = arith.constant 0 : i32
    %c0_i32_0 = arith.constant 0 : i32
    %c0_i32_1 = arith.constant 0 : i32
    return %c0_i32, %arg0, %c0_i32_0 : i32, i32, i32
  }
  func.func @transform_1(%arg0: i32) -> (i32, i32) {
    %c0_i32 = arith.constant 0 : i32
    %c0_i32_0 = arith.constant 0 : i32
    %c0_i32_1 = arith.constant 0 : i32
    return %c0_i32, %c0_i32_0 : i32, i32
  }
  func.func @transform_2(%arg0: i32) -> (i32, i32) {
    %c0_i32 = arith.constant 0 : i32
    %c0_i32_0 = arith.constant 0 : i32
    %c0_i32_1 = arith.constant 0 : i32
    return %c0_i32, %c0_i32_0 : i32, i32
  }
  func.func @transform_3(%arg0: i32) -> (i32, i32) {
    %c0_i32 = arith.constant 0 : i32
    %c0_i32_0 = arith.constant 0 : i32
    return %arg0, %c0_i32 : i32, i32
  }
}

module attributes {stable_mosaic.version = 11 : i64} {
  func.func @_fc_stack_kernel(%arg0: i32, %arg1: memref<8x400xf32, #tpu.memory_space<vmem>>, %arg2: memref<400x128xf32, #tpu.memory_space<vmem>>, %arg3: memref<1x128xf32, #tpu.memory_space<vmem>>, %arg4: memref<128x128xf32, #tpu.memory_space<vmem>>, %arg5: memref<1x128xf32, #tpu.memory_space<vmem>>, %arg6: memref<128x128xf32, #tpu.memory_space<vmem>>, %arg7: memref<1x128xf32, #tpu.memory_space<vmem>>, %arg8: memref<8x128xf32, #tpu.memory_space<vmem>>) attributes {dimension_semantics = [#tpu.dimension_semantics<parallel>], iteration_bounds = array<i64: 1>, scalar_prefetch = 0 : i64, scratch_operands = 0 : i64, tpu.core_type = #tpu.core_type<tc>, window_params = [{transform_indices = @transform_0, window_bounds = array<i64: 8, 400>}, {pipeline_mode = #tpu.pipeline_mode<synchronous>, transform_indices = @transform_1, window_bounds = array<i64: 400, 128>}, {pipeline_mode = #tpu.pipeline_mode<synchronous>, transform_indices = @transform_2, window_bounds = array<i64: 1, 128>}, {pipeline_mode = #tpu.pipeline_mode<synchronous>, transform_indices = @transform_3, window_bounds = array<i64: 128, 128>}, {pipeline_mode = #tpu.pipeline_mode<synchronous>, transform_indices = @transform_4, window_bounds = array<i64: 1, 128>}, {pipeline_mode = #tpu.pipeline_mode<synchronous>, transform_indices = @transform_5, window_bounds = array<i64: 128, 128>}, {pipeline_mode = #tpu.pipeline_mode<synchronous>, transform_indices = @transform_6, window_bounds = array<i64: 1, 128>}, {transform_indices = @transform_7, window_bounds = array<i64: 8, 128>}]} {
    %c0 = arith.constant 0 : index
    %c0_0 = arith.constant 0 : index
    %0 = vector.load %arg1[%c0, %c0_0] : memref<8x400xf32, #tpu.memory_space<vmem>>, vector<8x400xf32>
    %c0_1 = arith.constant 0 : index
    %c0_2 = arith.constant 0 : index
    %1 = vector.load %arg2[%c0_1, %c0_2] : memref<400x128xf32, #tpu.memory_space<vmem>>, vector<400x128xf32>
    %cst = arith.constant dense<0.000000e+00> : vector<8x128xf32>
    %2 = tpu.matmul %0, %1, %cst {dimension_numbers = #tpu.dot_dimension_numbers<[1], [0], [0], [1], [0, 0, 1, 1], [], []>} : vector<8x400xf32>, vector<400x128xf32>, vector<8x128xf32> -> vector<8x128xf32>
    %c0_3 = arith.constant 0 : index
    %c0_4 = arith.constant 0 : index
    %3 = vector.load %arg3[%c0_3, %c0_4] : memref<1x128xf32, #tpu.memory_space<vmem>>, vector<1x128xf32>
    %4 = vector.broadcast %3 : vector<1x128xf32> to vector<8x128xf32>
    %5 = arith.addf %2, %4 : vector<8x128xf32>
    %cst_5 = arith.constant 0.000000e+00 : f32
    %6 = vector.broadcast %cst_5 : f32 to vector<8x128xf32>
    %7 = arith.maximumf %5, %6 : vector<8x128xf32>
    %c0_6 = arith.constant 0 : index
    %c0_7 = arith.constant 0 : index
    %8 = vector.load %arg4[%c0_6, %c0_7] : memref<128x128xf32, #tpu.memory_space<vmem>>, vector<128x128xf32>
    %cst_8 = arith.constant dense<0.000000e+00> : vector<8x128xf32>
    %9 = tpu.matmul %7, %8, %cst_8 {dimension_numbers = #tpu.dot_dimension_numbers<[1], [0], [0], [1], [0, 0, 1, 1], [], []>} : vector<8x128xf32>, vector<128x128xf32>, vector<8x128xf32> -> vector<8x128xf32>
    %c0_9 = arith.constant 0 : index
    %c0_10 = arith.constant 0 : index
    %10 = vector.load %arg5[%c0_9, %c0_10] : memref<1x128xf32, #tpu.memory_space<vmem>>, vector<1x128xf32>
    %11 = vector.broadcast %10 : vector<1x128xf32> to vector<8x128xf32>
    %12 = arith.addf %9, %11 : vector<8x128xf32>
    %cst_11 = arith.constant 0.000000e+00 : f32
    %13 = vector.broadcast %cst_11 : f32 to vector<8x128xf32>
    %14 = arith.maximumf %12, %13 : vector<8x128xf32>
    %c0_12 = arith.constant 0 : index
    %c0_13 = arith.constant 0 : index
    %15 = vector.load %arg6[%c0_12, %c0_13] : memref<128x128xf32, #tpu.memory_space<vmem>>, vector<128x128xf32>
    %cst_14 = arith.constant dense<0.000000e+00> : vector<8x128xf32>
    %16 = tpu.matmul %14, %15, %cst_14 {dimension_numbers = #tpu.dot_dimension_numbers<[1], [0], [0], [1], [0, 0, 1, 1], [], []>} : vector<8x128xf32>, vector<128x128xf32>, vector<8x128xf32> -> vector<8x128xf32>
    %c0_15 = arith.constant 0 : index
    %c0_16 = arith.constant 0 : index
    %17 = vector.load %arg7[%c0_15, %c0_16] : memref<1x128xf32, #tpu.memory_space<vmem>>, vector<1x128xf32>
    %18 = vector.broadcast %17 : vector<1x128xf32> to vector<8x128xf32>
    %19 = arith.addf %16, %18 : vector<8x128xf32>
    %c0_17 = arith.constant 0 : index
    %c0_18 = arith.constant 0 : index
    %20 = vector.load %arg8[%c0_17, %c0_18] : memref<8x128xf32, #tpu.memory_space<vmem>>, vector<8x128xf32>
    tpu.vector_store %arg8[%c0_17, %c0_18], %19 {strides = array<i32>} : memref<8x128xf32, #tpu.memory_space<vmem>>, vector<8x128xf32>,
    return
  }
  func.func @transform_0(%arg0: i32) -> (i32, i32) {
    %c0_i32 = arith.constant 0 : i32
    %c0_i32_0 = arith.constant 0 : i32
    return %arg0, %c0_i32 : i32, i32
  }
  func.func @transform_1(%arg0: i32) -> (i32, i32) {
    %c0_i32 = arith.constant 0 : i32
    %c0_i32_0 = arith.constant 0 : i32
    %c0_i32_1 = arith.constant 0 : i32
    return %c0_i32, %c0_i32_0 : i32, i32
  }
  func.func @transform_2(%arg0: i32) -> (i32, i32) {
    %c0_i32 = arith.constant 0 : i32
    %c0_i32_0 = arith.constant 0 : i32
    %c0_i32_1 = arith.constant 0 : i32
    return %c0_i32, %c0_i32_0 : i32, i32
  }
  func.func @transform_3(%arg0: i32) -> (i32, i32) {
    %c0_i32 = arith.constant 0 : i32
    %c0_i32_0 = arith.constant 0 : i32
    %c0_i32_1 = arith.constant 0 : i32
    return %c0_i32, %c0_i32_0 : i32, i32
  }
  func.func @transform_4(%arg0: i32) -> (i32, i32) {
    %c0_i32 = arith.constant 0 : i32
    %c0_i32_0 = arith.constant 0 : i32
    %c0_i32_1 = arith.constant 0 : i32
    return %c0_i32, %c0_i32_0 : i32, i32
  }
  func.func @transform_5(%arg0: i32) -> (i32, i32) {
    %c0_i32 = arith.constant 0 : i32
    %c0_i32_0 = arith.constant 0 : i32
    %c0_i32_1 = arith.constant 0 : i32
    return %c0_i32, %c0_i32_0 : i32, i32
  }
  func.func @transform_6(%arg0: i32) -> (i32, i32) {
    %c0_i32 = arith.constant 0 : i32
    %c0_i32_0 = arith.constant 0 : i32
    %c0_i32_1 = arith.constant 0 : i32
    return %c0_i32, %c0_i32_0 : i32, i32
  }
  func.func @transform_7(%arg0: i32) -> (i32, i32) {
    %c0_i32 = arith.constant 0 : i32
    %c0_i32_0 = arith.constant 0 : i32
    return %arg0, %c0_i32 : i32, i32
  }
}

</mosaic_0001>

<bundles_post_ra>
// kernel: mcmc_lenet_forward.3
= control target key start
LH: loop header
LB: loop body
LE: loop exit
PB: predicated region body
PF: predicated region fallthrough
CT: control target
= control target key end

     0   :  { %vm214_vm0 = vcmask 261120   ;;  %s2942_s1 = inlined_call_operand.vmem [shape: f32[32,128], index: 1, kind: input, shape index: {}]   ;;  %s2943_s0 = inlined_call_operand.vmem [shape: f32[4,392,32], index: 0, kind: input, shape index: {}]   ;;  %s2944_s2 = inlined_call_operand.vmem [shape: f32[1,128], index: 2, kind: input, shape index: {}]   ;;  %s2945_s3 = inlined_call_operand.vmem [shape: f32[392,128], index: 3, kind: output, shape index: {}]  }
   0x1   :  { %v213_v0 = vld [vmem:[%s2942_s1 + $0x18] sm:$0xff]  ;;  %v212_v1 = vld [vmem:[%s2942_s1 + $0x10] sm:$0xff]  ;;  %v211_v2 = vld [vmem:[%s2942_s1 + $0x8] sm:$0xff] }
   0x2   :  { %1907 = vmatpush.msra.mxu2 %v213_v0  ;;  %1908 = vmatpush.msra.mxu3 %v213_v0  ;;  %v210_v3 = vld [vmem:[%s2942_s1] sm:$0xff]  ;;  %v112_v4 = vld [vmem:[%s2943_s0 + $0x310] sm:$0xff]  ;;  %v161_v5 = vld [vmem:[%s2943_s0 + $0x498] sm:$0xff] }
   0x3   :  { %815 = vmatpush.msra.mxu0 %v213_v0  ;;  %1906 = vmatpush.msra.mxu1 %v213_v0  ;;  %v14_v6 = vld [vmem:[%s2943_s0] sm:$0xff]  ;;  %v63_v7 = vld [vmem:[%s2943_s0 + $0x188] sm:$0xff]  ;;  %v113_v8 = vld [vmem:[%s2943_s0 + $0x318] sm:$0xff] }
   0x4   :  { %1910 = vmatpush.msra.mxu2 %v212_v1  ;;  %1911 = vmatpush.msra.mxu3 %v212_v1  ;;  %v162_v9 = vld [vmem:[%s2943_s0 + $0x4a0] sm:$0xff]  ;;  %v15_v10 = vld [vmem:[%s2943_s0 + $0x8] sm:$0xff]  ;;  %v64_v11 = vld [vmem:[%s2943_s0 + $0x190] sm:$0xff] }
   0x5   :  { %816 = vmatpush.msra.mxu0 %v212_v1  ;;  %1909 = vmatpush.msra.mxu1 %v212_v1  ;;  %v114_v12 = vld [vmem:[%s2943_s0 + $0x320] sm:$0xff]  ;;  %v163_v13 = vld [vmem:[%s2943_s0 + $0x4a8] sm:$0xff]  ;;  %v16_v14 = vld [vmem:[%s2943_s0 + $0x10] sm:$0xff] }
   0x6   :  { %1913 = vmatpush.msra.mxu2 %v211_v2  ;;  %1914 = vmatpush.msra.mxu3 %v211_v2  ;;  %v65_v15 = vld [vmem:[%s2943_s0 + $0x198] sm:$0xff]  ;;  %v115_v16 = vld [vmem:[%s2943_s0 + $0x328] sm:$0xff]  ;;  %v164_v17 = vld [vmem:[%s2943_s0 + $0x4b0] sm:$0xff] }
   0x7   :  { %817 = vmatpush.msra.mxu0 %v211_v2  ;;  %1912 = vmatpush.msra.mxu1 %v211_v2  ;;  %v17_v18 = vld [vmem:[%s2943_s0 + $0x18] sm:$0xff]  ;;  %v66_v19 = vld [vmem:[%s2943_s0 + $0x1a0] sm:$0xff]  ;;  %v116_v20 = vld [vmem:[%s2943_s0 + $0x330] sm:$0xff] }
   0x8   :  { %1916 = vmatpush.msra.mxu2 %v210_v3  ;;  %1917 = vmatpush.msra.mxu3 %v210_v3  ;;  %v165_v21 = vld [vmem:[%s2943_s0 + $0x4b8] sm:$0xff]  ;;  %v18_v22 = vld [vmem:[%s2943_s0 + $0x20] sm:$0xff]  ;;  %v67_v23 = vld [vmem:[%s2943_s0 + $0x1a8] sm:$0xff] }
   0x9   :  { %1808 = vmatmul.msk.f32.vlgmr.msra.gmra.mxu2 %vm214_vm0, %v112_v4  ;;  %1857 = vmatmul.msk.f32.vlgmr.msra.gmra.mxu3 %vm214_vm0, %v161_v5  ;;  %v117_v24 = vld [vmem:[%s2943_s0 + $0x338] sm:$0xff]  ;;  %v166_v25 = vld [vmem:[%s2943_s0 + $0x4c0] sm:$0xff]  ;;  %v19_v26 = vld [vmem:[%s2943_s0 + $0x28] sm:$0xff] }
   0xa   :  { %818 = vmatpush.msra.mxu0 %v210_v3  ;;  %1915 = vmatpush.msra.mxu1 %v210_v3  ;;  %v68_v27 = vld [vmem:[%s2943_s0 + $0x1b0] sm:$0xff]  ;;  %v118_v28 = vld [vmem:[%s2943_s0 + $0x340] sm:$0xff]  ;;  %v167_v29 = vld [vmem:[%s2943_s0 + $0x4c8] sm:$0xff] }
   0xb   :  { %1710 = vmatmul.msk.f32.vlgmr.msra.gmra.mxu0 %vm214_vm0, %v14_v6  ;;  %1759 = vmatmul.msk.f32.vlgmr.msra.gmra.mxu1 %vm214_vm0, %v63_v7  ;;  %v20_v30 = vld [vmem:[%s2943_s0 + $0x30] sm:$0xff]  ;;  %v69_v31 = vld [vmem:[%s2943_s0 + $0x1b8] sm:$0xff]  ;;  %v119_v32 = vld [vmem:[%s2943_s0 + $0x348] sm:$0xff] }
   0xc   :  { %v168_v33 = vld [vmem:[%s2943_s0 + $0x4d0] sm:$0xff]  ;;  %v21_v34 = vld [vmem:[%s2943_s0 + $0x38] sm:$0xff]  ;;  %v70_v35 = vld [vmem:[%s2943_s0 + $0x1c0] sm:$0xff] }
   0xd   :  { %v120_v36 = vld [vmem:[%s2943_s0 + $0x350] sm:$0xff]  ;;  %v169_v37 = vld [vmem:[%s2943_s0 + $0x4d8] sm:$0xff]  ;;  %v22_v38 = vld [vmem:[%s2943_s0 + $0x40] sm:$0xff] }
   0xe   :  { %v71_v39 = vld [vmem:[%s2943_s0 + $0x1c8] sm:$0xff]  ;;  %v121_v40 = vld [vmem:[%s2943_s0 + $0x358] sm:$0xff]  ;;  %v170_v41 = vld [vmem:[%s2943_s0 + $0x4e0] sm:$0xff] }
   0xf   :  { %v23_v42 = vld [vmem:[%s2943_s0 + $0x48] sm:$0xff]  ;;  %v72_v43 = vld [vmem:[%s2943_s0 + $0x1d0] sm:$0xff]  ;;  %v122_v44 = vld [vmem:[%s2943_s0 + $0x360] sm:$0xff] }
  0x10   :  { %v171_v45 = vld [vmem:[%s2943_s0 + $0x4e8] sm:$0xff]  ;;  %v24_v46 = vld [vmem:[%s2943_s0 + $0x50] sm:$0xff]  ;;  %v73_v47 = vld [vmem:[%s2943_s0 + $0x1d8] sm:$0xff] }
  0x11   :  { %1809 = vmatmul.msk.f32.gmra.mxu2 %vm214_vm0, %v113_v8  ;;  %1858 = vmatmul.msk.f32.gmra.mxu3 %vm214_vm0, %v162_v9  ;;  %v123_v48 = vld [vmem:[%s2943_s0 + $0x368] sm:$0xff]  ;;  %v172_v49 = vld [vmem:[%s2943_s0 + $0x4f0] sm:$0xff]  ;;  %v25_v50 = vld [vmem:[%s2943_s0 + $0x58] sm:$0xff] }
  0x12   :  { %v74_v51 = vld [vmem:[%s2943_s0 + $0x1e0] sm:$0xff]  ;;  %v124_v52 = vld [vmem:[%s2943_s0 + $0x370] sm:$0xff]  ;;  %v173_v53 = vld [vmem:[%s2943_s0 + $0x4f8] sm:$0xff] }
  0x13   :  { %1711 = vmatmul.msk.f32.gmra.mxu0 %vm214_vm0, %v15_v10  ;;  %1760 = vmatmul.msk.f32.gmra.mxu1 %vm214_vm0, %v64_v11  ;;  %v26_v54 = vld [vmem:[%s2943_s0 + $0x60] sm:$0xff]  ;;  %v75_v55 = vld [vmem:[%s2943_s0 + $0x1e8] sm:$0xff]  ;;  %v125_v56 = vld [vmem:[%s2943_s0 + $0x378] sm:$0xff] }
  0x14   :  { %v174_v57 = vld [vmem:[%s2943_s0 + $0x500] sm:$0xff]  ;;  %v27_v58 = vld [vmem:[%s2943_s0 + $0x68] sm:$0xff]  ;;  %v76_v59 = vld [vmem:[%s2943_s0 + $0x1f0] sm:$0xff] }
  0x15   :  { %v126_v60 = vld [vmem:[%s2943_s0 + $0x380] sm:$0xff]  ;;  %v175_v61 = vld [vmem:[%s2943_s0 + $0x508] sm:$0xff]  ;;  %v28_v62 = vld [vmem:[%s2943_s0 + $0x70] sm:$0xff] }
  0x16   :  { %v77_v63 = vld [vmem:[%s2943_s0 + $0x1f8] sm:$0xff]  ;;  %v127_v0 = vld [vmem:[%s2943_s0 + $0x388] sm:$0xff]  ;;  %v176_v1 = vld [vmem:[%s2943_s0 + $0x510] sm:$0xff] }
  0x17   :  { %v29_v2 = vld [vmem:[%s2943_s0 + $0x78] sm:$0xff]  ;;  %v78_v3 = vld [vmem:[%s2943_s0 + $0x200] sm:$0xff]  ;;  %v128_v4 = vld [vmem:[%s2943_s0 + $0x390] sm:$0xff] }
  0x18   :  { %v177_v5 = vld [vmem:[%s2943_s0 + $0x518] sm:$0xff]  ;;  %v30_v8 = vld [vmem:[%s2943_s0 + $0x80] sm:$0xff]  ;;  %v79_v9 = vld [vmem:[%s2943_s0 + $0x208] sm:$0xff] }
  0x19   :  { %1810 = vmatmul.msk.f32.gmra.mxu2 %vm214_vm0, %v114_v12  ;;  %1859 = vmatmul.msk.f32.gmra.mxu3 %vm214_vm0, %v163_v13 }
  0x1b   :  { %1712 = vmatmul.msk.f32.gmra.mxu0 %vm214_vm0, %v16_v14  ;;  %1761 = vmatmul.msk.f32.gmra.mxu1 %vm214_vm0, %v65_v15  ;;  %v2227_v14 = vld [vmem:[%s2944_s2] ss:$0 sm:$0xff]  ;;  %v129_v15 = vld [vmem:[%s2943_s0 + $0x398] sm:$0xff] }
  0x21   :  { %1811 = vmatmul.msk.f32.gmra.mxu2 %vm214_vm0, %v115_v16  ;;  %1860 = vmatmul.msk.f32.gmra.mxu3 %vm214_vm0, %v164_v17  ;;  %v178_v16 = vld [vmem:[%s2943_s0 + $0x520] sm:$0xff] }
  0x23   :  { %1713 = vmatmul.msk.f32.gmra.mxu0 %vm214_vm0, %v17_v18  ;;  %1762 = vmatmul.msk.f32.gmra.mxu1 %vm214_vm0, %v66_v19 }
  0x29   :  { %1812 = vmatmul.msk.f32.gmra.mxu2 %vm214_vm0, %v116_v20  ;;  %1861 = vmatmul.msk.f32.gmra.mxu3 %vm214_vm0, %v165_v21  ;;  %v31_v20 = vld [vmem:[%s2943_s0 + $0x88] sm:$0xff]  ;;  %v80_v21 = vld [vmem:[%s2943_s0 + $0x210] sm:$0xff] }
  0x2b   :  { %1714 = vmatmul.msk.f32.gmra.mxu0 %vm214_vm0, %v18_v22  ;;  %1763 = vmatmul.msk.f32.gmra.mxu1 %vm214_vm0, %v67_v23 }
  0x31   :  { %1813 = vmatmul.msk.f32.gmra.mxu2 %vm214_vm0, %v117_v24  ;;  %1862 = vmatmul.msk.f32.gmra.mxu3 %vm214_vm0, %v166_v25 }
  0x33   :  { %1715 = vmatmul.msk.f32.gmra.mxu0 %vm214_vm0, %v19_v26  ;;  %1764 = vmatmul.msk.f32.gmra.mxu1 %vm214_vm0, %v68_v27 }
  0x39   :  { %1814 = vmatmul.msk.f32.gmra.mxu2 %vm214_vm0, %v118_v28  ;;  %1863 = vmatmul.msk.f32.gmra.mxu3 %vm214_vm0, %v167_v29  ;;  %v130_v28 = vld [vmem:[%s2943_s0 + $0x3a0] sm:$0xff]  ;;  %v179_v29 = vld [vmem:[%s2943_s0 + $0x528] sm:$0xff] }
  0x3b   :  { %1716 = vmatmul.msk.f32.gmra.mxu0 %vm214_vm0, %v20_v30  ;;  %1765 = vmatmul.msk.f32.gmra.mxu1 %vm214_vm0, %v69_v31 }
  0x41   :  { %1815 = vmatmul.msk.f32.gmra.mxu2 %vm214_vm0, %v119_v32  ;;  %1864 = vmatmul.msk.f32.gmra.mxu3 %vm214_vm0, %v168_v33  ;;  %v32_v33 = vld [vmem:[%s2943_s0 + $0x90] sm:$0xff] }
  0x43   :  { %1717 = vmatmul.msk.f32.gmra.mxu0 %vm214_vm0, %v21_v34  ;;  %1766 = vmatmul.msk.f32.gmra.mxu1 %vm214_vm0, %v70_v35  ;;  %v81_v34 = vld [vmem:[%s2943_s0 + $0x218] sm:$0xff] }
  0x49   :  { %1816 = vmatmul.msk.f32.gmra.mxu2 %vm214_vm0, %v120_v36  ;;  %1865 = vmatmul.msk.f32.gmra.mxu3 %vm214_vm0, %v169_v37 }
  0x4b   :  { %1718 = vmatmul.msk.f32.gmra.mxu0 %vm214_vm0, %v22_v38  ;;  %1767 = vmatmul.msk.f32.gmra.mxu1 %vm214_vm0, %v71_v39 }
  0x51   :  { %1817 = vmatmul.msk.f32.gmra.mxu2 %vm214_vm0, %v121_v40  ;;  %1866 = vmatmul.msk.f32.gmra.mxu3 %vm214_vm0, %v170_v41  ;;  %v131_v41 = vld [vmem:[%s2943_s0 + $0x3a8] sm:$0xff] }
  0x53   :  { %1719 = vmatmul.msk.f32.gmra.mxu0 %vm214_vm0, %v23_v42  ;;  %1768 = vmatmul.msk.f32.gmra.mxu1 %vm214_vm0, %v72_v43  ;;  %v180_v42 = vld [vmem:[%s2943_s0 + $0x530] sm:$0xff] }
  0x59   :  { %1818 = vmatmul.msk.f32.gmra.mxu2 %vm214_vm0, %v122_v44  ;;  %1867 = vmatmul.msk.f32.gmra.mxu3 %vm214_vm0, %v171_v45 }
  0x5b   :  { %1720 = vmatmul.msk.f32.gmra.mxu0 %vm214_vm0, %v24_v46  ;;  %1769 = vmatmul.msk.f32.gmra.mxu1 %vm214_vm0, %v73_v47  ;;  %v33_v46 = vld [vmem:[%s2943_s0 + $0x98] sm:$0xff]  ;;  %v82_v47 = vld [vmem:[%s2943_s0 + $0x220] sm:$0xff] }
  0x61   :  { %1819 = vmatmul.msk.f32.gmra.mxu2 %vm214_vm0, %v123_v48  ;;  %1868 = vmatmul.msk.f32.gmra.mxu3 %vm214_vm0, %v172_v49 }
  0x63   :  { %1721 = vmatmul.msk.f32.gmra.mxu0 %vm214_vm0, %v25_v50  ;;  %1770 = vmatmul.msk.f32.gmra.mxu1 %vm214_vm0, %v74_v51 }
  0x69   :  { %1820 = vmatmul.msk.f32.gmra.mxu2 %vm214_vm0, %v124_v52  ;;  %1869 = vmatmul.msk.f32.gmra.mxu3 %vm214_vm0, %v173_v53 }
  0x6b   :  { %1722 = vmatmul.msk.f32.gmra.mxu0 %vm214_vm0, %v26_v54  ;;  %1771 = vmatmul.msk.f32.gmra.mxu1 %vm214_vm0, %v75_v55  ;;  %v132_v54 = vld [vmem:[%s2943_s0 + $0x3b0] sm:$0xff]  ;;  %v181_v55 = vld [vmem:[%s2943_s0 + $0x538] sm:$0xff] }
  0x71   :  { %1821 = vmatmul.msk.f32.gmra.mxu2 %vm214_vm0, %v125_v56  ;;  %1870 = vmatmul.msk.f32.gmra.mxu3 %vm214_vm0, %v174_v57 }
  0x73   :  { %1723 = vmatmul.msk.f32.gmra.mxu0 %vm214_vm0, %v27_v58  ;;  %1772 = vmatmul.msk.f32.gmra.mxu1 %vm214_vm0, %v76_v59  ;;  %v34_v59 = vld [vmem:[%s2943_s0 + $0xa0] sm:$0xff] }
  0x79   :  { %1822 = vmatmul.msk.f32.gmra.mxu2 %vm214_vm0, %v126_v60  ;;  %1871 = vmatmul.msk.f32.gmra.mxu3 %vm214_vm0, %v175_v61  ;;  %v83_v60 = vld [vmem:[%s2943_s0 + $0x228] sm:$0xff] }
  0x7b   :  { %1724 = vmatmul.msk.f32.gmra.mxu0 %vm214_vm0, %v28_v62  ;;  %1773 = vmatmul.msk.f32.gmra.mxu1 %vm214_vm0, %v77_v63 }
  0x81   :  { %1823 = vmatmul.msk.f32.gmra.mxu2 %vm214_vm0, %v127_v0  ;;  %1872 = vmatmul.msk.f32.gmra.mxu3 %vm214_vm0, %v176_v1 }
  0x83   :  { %1725 = vmatmul.msk.f32.gmra.mxu0 %vm214_vm0, %v29_v2  ;;  %1774 = vmatmul.msk.f32.gmra.mxu1 %vm214_vm0, %v78_v3  ;;  %v133_v3 = vld [vmem:[%s2943_s0 + $0x3b8] sm:$0xff] }
  0x88   :  { %v820_v6 = vpop.f32.mrf.mxu0  ;;  %v967_v7 = vpop.f32.mrf.mxu1 }
  0x89   :  { %1824 = vmatmul.msk.f32.gmra.mxu2 %vm214_vm0, %v128_v4  ;;  %v1408_v10 = vmax.f32 %v820_v6, %v967_v7  ;;  %1873 = vmatmul.msk.f32.gmra.mxu3 %vm214_vm0, %v177_v5  ;;  %v182_v4 = vld [vmem:[%s2943_s0 + $0x540] sm:$0xff] }
  0x8b   :  { %1726 = vmatmul.msk.f32.gmra.mxu0 %vm214_vm0, %v30_v8  ;;  %1775 = vmatmul.msk.f32.gmra.mxu1 %vm214_vm0, %v79_v9  ;;  %v35_v8 = vld [vmem:[%s2943_s0 + $0xa8] sm:$0xff]  ;;  %v84_v9 = vld [vmem:[%s2943_s0 + $0x230] sm:$0xff] }
  0x8c   :  { %v1114_v11 = vpop.f32.mrf.mxu2  ;;  %v1261_v12 = vpop.f32.mrf.mxu3 }
  0x8d   :  { %v1409_v13 = vmax.f32 %v1408_v10, %v1114_v11 }
  0x8f   :  { %v1410_v17 = vmax.f32 %v1409_v13, %v1261_v12 }
  0x90   :  { %v823_v18 = vpop.f32.mrf.mxu0  ;;  %v970_v19 = vpop.f32.mrf.mxu1 }
  0x91   :  { %v1559_v22 = vadd.f32 %v2227_v14, %v1410_v17  ;;  %1825 = vmatmul.msk.f32.gmra.mxu2 %vm214_vm0, %v129_v15  ;;  %v1411_v23 = vmax.f32 %v823_v18, %v970_v19  ;;  %1874 = vmatmul.msk.f32.gmra.mxu3 %vm214_vm0, %v178_v16  ;;  %v134_v17 = vld [vmem:[%s2943_s0 + $0x3c0] sm:$0xff]  ;;  %v183_v18 = vld [vmem:[%s2943_s0 + $0x548] sm:$0xff] }
  0x93   :  { %v1608_v24 = vmax.f32 %v1559_v22, 0.0  ;;  %1727 = vmatmul.msk.f32.gmra.mxu0 %vm214_vm0, %v31_v20  ;;  %1776 = vmatmul.msk.f32.gmra.mxu1 %vm214_vm0, %v80_v21  ;;  %v36_v22 = vld [vmem:[%s2943_s0 + $0xb0] sm:$0xff] }
  0x94   :  { %v1117_v25 = vpop.f32.mrf.mxu2  ;;  %v1264_v26 = vpop.f32.mrf.mxu3 }
  0x95   :  { %1657 = vst [vmem:[%s2945_s3] sm:$0xff] %v1608_v24  ;;  %v1412_v27 = vmax.f32 %v1411_v23, %v1117_v25  ;;  %v85_v23 = vld [vmem:[%s2943_s0 + $0x238] sm:$0xff] }
  0x97   :  { %v1413_v30 = vmax.f32 %v1412_v27, %v1264_v26 }
  0x98   :  { %v826_v31 = vpop.f32.mrf.mxu0  ;;  %v973_v32 = vpop.f32.mrf.mxu1 }
  0x99   :  { %v1560_v35 = vadd.f32 %v2227_v14, %v1413_v30  ;;  %1826 = vmatmul.msk.f32.gmra.mxu2 %vm214_vm0, %v130_v28  ;;  %v1414_v36 = vmax.f32 %v826_v31, %v973_v32  ;;  %1875 = vmatmul.msk.f32.gmra.mxu3 %vm214_vm0, %v179_v29  ;;  %v135_v30 = vld [vmem:[%s2943_s0 + $0x3c8] sm:$0xff]  ;;  %v184_v31 = vld [vmem:[%s2943_s0 + $0x550] sm:$0xff] }
  0x9b   :  { %v1609_v37 = vmax.f32 %v1560_v35, 0.0  ;;  %1728 = vmatmul.msk.f32.gmra.mxu0 %vm214_vm0, %v32_v33  ;;  %1777 = vmatmul.msk.f32.gmra.mxu1 %vm214_vm0, %v81_v34  ;;  %v37_v35 = vld [vmem:[%s2943_s0 + $0xb8] sm:$0xff] }
  0x9c   :  { %v1120_v38 = vpop.f32.mrf.mxu2  ;;  %v1267_v39 = vpop.f32.mrf.mxu3 }
  0x9d   :  { %1658 = vst [vmem:[%s2945_s3 + $0x8] sm:$0xff] %v1609_v37  ;;  %v1415_v40 = vmax.f32 %v1414_v36, %v1120_v38  ;;  %v86_v36 = vld [vmem:[%s2943_s0 + $0x240] sm:$0xff] }
  0x9f   :  { %v1416_v43 = vmax.f32 %v1415_v40, %v1267_v39 }
  0xa0   :  { %v829_v44 = vpop.f32.mrf.mxu0  ;;  %v976_v45 = vpop.f32.mrf.mxu1 }
  0xa1   :  { %v1561_v48 = vadd.f32 %v2227_v14, %v1416_v43  ;;  %1827 = vmatmul.msk.f32.gmra.mxu2 %vm214_vm0, %v131_v41  ;;  %v1417_v49 = vmax.f32 %v829_v44, %v976_v45  ;;  %1876 = vmatmul.msk.f32.gmra.mxu3 %vm214_vm0, %v180_v42  ;;  %v136_v43 = vld [vmem:[%s2943_s0 + $0x3d0] sm:$0xff]  ;;  %v185_v44 = vld [vmem:[%s2943_s0 + $0x558] sm:$0xff] }
  0xa3   :  { %v1610_v50 = vmax.f32 %v1561_v48, 0.0  ;;  %1729 = vmatmul.msk.f32.gmra.mxu0 %vm214_vm0, %v33_v46  ;;  %1778 = vmatmul.msk.f32.gmra.mxu1 %vm214_vm0, %v82_v47  ;;  %v38_v48 = vld [vmem:[%s2943_s0 + $0xc0] sm:$0xff] }
  0xa4   :  { %v1123_v51 = vpop.f32.mrf.mxu2  ;;  %v1270_v52 = vpop.f32.mrf.mxu3 }
  0xa5   :  { %1659 = vst [vmem:[%s2945_s3 + $0x10] sm:$0xff] %v1610_v50  ;;  %v1418_v53 = vmax.f32 %v1417_v49, %v1123_v51  ;;  %v87_v49 = vld [vmem:[%s2943_s0 + $0x248] sm:$0xff] }
  0xa7   :  { %v1419_v56 = vmax.f32 %v1418_v53, %v1270_v52 }
  0xa8   :  { %v832_v57 = vpop.f32.mrf.mxu0  ;;  %v979_v58 = vpop.f32.mrf.mxu1 }
  0xa9   :  { %v1562_v61 = vadd.f32 %v2227_v14, %v1419_v56  ;;  %1828 = vmatmul.msk.f32.gmra.mxu2 %vm214_vm0, %v132_v54  ;;  %v1420_v62 = vmax.f32 %v832_v57, %v979_v58  ;;  %1877 = vmatmul.msk.f32.gmra.mxu3 %vm214_vm0, %v181_v55  ;;  %v137_v56 = vld [vmem:[%s2943_s0 + $0x3d8] sm:$0xff]  ;;  %v186_v57 = vld [vmem:[%s2943_s0 + $0x560] sm:$0xff] }
  0xab   :  { %v1611_v63 = vmax.f32 %v1562_v61, 0.0  ;;  %1730 = vmatmul.msk.f32.gmra.mxu0 %vm214_vm0, %v34_v59  ;;  %1779 = vmatmul.msk.f32.gmra.mxu1 %vm214_vm0, %v83_v60  ;;  %v39_v61 = vld [vmem:[%s2943_s0 + $0xc8] sm:$0xff] }
  0xac   :  { %v1126_v0 = vpop.f32.mrf.mxu2  ;;  %v1273_v1 = vpop.f32.mrf.mxu3 }
  0xad   :  { %1660 = vst [vmem:[%s2945_s3 + $0x18] sm:$0xff] %v1611_v63  ;;  %v1421_v2 = vmax.f32 %v1420_v62, %v1126_v0  ;;  %v88_v62 = vld [vmem:[%s2943_s0 + $0x250] sm:$0xff] }
  0xaf   :  { %v1422_v5 = vmax.f32 %v1421_v2, %v1273_v1 }
  0xb0   :  { %v835_v6 = vpop.f32.mrf.mxu0  ;;  %v982_v7 = vpop.f32.mrf.mxu1 }
  0xb1   :  { %v1563_v10 = vadd.f32 %v2227_v14, %v1422_v5  ;;  %1829 = vmatmul.msk.f32.gmra.mxu2 %vm214_vm0, %v133_v3  ;;  %v1423_v11 = vmax.f32 %v835_v6, %v982_v7  ;;  %1878 = vmatmul.msk.f32.gmra.mxu3 %vm214_vm0, %v182_v4  ;;  %v138_v5 = vld [vmem:[%s2943_s0 + $0x3e0] sm:$0xff]  ;;  %v187_v6 = vld [vmem:[%s2943_s0 + $0x568] sm:$0xff] }
  0xb3   :  { %v1612_v12 = vmax.f32 %v1563_v10, 0.0  ;;  %1731 = vmatmul.msk.f32.gmra.mxu0 %vm214_vm0, %v35_v8  ;;  %1780 = vmatmul.msk.f32.gmra.mxu1 %vm214_vm0, %v84_v9  ;;  %v40_v10 = vld [vmem:[%s2943_s0 + $0xd0] sm:$0xff] }
  0xb4   :  { %v1129_v13 = vpop.f32.mrf.mxu2  ;;  %v1276_v15 = vpop.f32.mrf.mxu3 }
  0xb5   :  { %1661 = vst [vmem:[%s2945_s3 + $0x20] sm:$0xff] %v1612_v12  ;;  %v1424_v16 = vmax.f32 %v1423_v11, %v1129_v13  ;;  %v89_v11 = vld [vmem:[%s2943_s0 + $0x258] sm:$0xff] }
  0xb7   :  { %v1425_v19 = vmax.f32 %v1424_v16, %v1276_v15 }
  0xb8   :  { %v838_v20 = vpop.f32.mrf.mxu0  ;;  %v985_v21 = vpop.f32.mrf.mxu1 }
  0xb9   :  { %v1564_v24 = vadd.f32 %v2227_v14, %v1425_v19  ;;  %1830 = vmatmul.msk.f32.gmra.mxu2 %vm214_vm0, %v134_v17  ;;  %v1426_v25 = vmax.f32 %v838_v20, %v985_v21  ;;  %1879 = vmatmul.msk.f32.gmra.mxu3 %vm214_vm0, %v183_v18  ;;  %v139_v19 = vld [vmem:[%s2943_s0 + $0x3e8] sm:$0xff]  ;;  %v188_v20 = vld [vmem:[%s2943_s0 + $0x570] sm:$0xff] }
  0xbb   :  { %v1613_v26 = vmax.f32 %v1564_v24, 0.0  ;;  %1732 = vmatmul.msk.f32.gmra.mxu0 %vm214_vm0, %v36_v22  ;;  %1781 = vmatmul.msk.f32.gmra.mxu1 %vm214_vm0, %v85_v23  ;;  %v41_v24 = vld [vmem:[%s2943_s0 + $0xd8] sm:$0xff] }
  0xbc   :  { %v1132_v27 = vpop.f32.mrf.mxu2  ;;  %v1279_v28 = vpop.f32.mrf.mxu3 }
  0xbd   :  { %1662 = vst [vmem:[%s2945_s3 + $0x28] sm:$0xff] %v1613_v26  ;;  %v1427_v29 = vmax.f32 %v1426_v25, %v1132_v27  ;;  %v90_v25 = vld [vmem:[%s2943_s0 + $0x260] sm:$0xff] }
  0xbf   :  { %v1428_v32 = vmax.f32 %v1427_v29, %v1279_v28 }
  0xc0   :  { %v841_v33 = vpop.f32.mrf.mxu0  ;;  %v988_v34 = vpop.f32.mrf.mxu1 }
  0xc1   :  { %v1565_v37 = vadd.f32 %v2227_v14, %v1428_v32  ;;  %1831 = vmatmul.msk.f32.gmra.mxu2 %vm214_vm0, %v135_v30  ;;  %v1429_v38 = vmax.f32 %v841_v33, %v988_v34  ;;  %1880 = vmatmul.msk.f32.gmra.mxu3 %vm214_vm0, %v184_v31  ;;  %v140_v32 = vld [vmem:[%s2943_s0 + $0x3f0] sm:$0xff]  ;;  %v189_v33 = vld [vmem:[%s2943_s0 + $0x578] sm:$0xff] }
  0xc3   :  { %v1614_v39 = vmax.f32 %v1565_v37, 0.0  ;;  %1733 = vmatmul.msk.f32.gmra.mxu0 %vm214_vm0, %v37_v35  ;;  %1782 = vmatmul.msk.f32.gmra.mxu1 %vm214_vm0, %v86_v36  ;;  %v42_v37 = vld [vmem:[%s2943_s0 + $0xe0] sm:$0xff] }
  0xc4   :  { %v1135_v40 = vpop.f32.mrf.mxu2  ;;  %v1282_v41 = vpop.f32.mrf.mxu3 }
  0xc5   :  { %1663 = vst [vmem:[%s2945_s3 + $0x30] sm:$0xff] %v1614_v39  ;;  %v1430_v42 = vmax.f32 %v1429_v38, %v1135_v40  ;;  %v91_v38 = vld [vmem:[%s2943_s0 + $0x268] sm:$0xff] }
  0xc7   :  { %v1431_v45 = vmax.f32 %v1430_v42, %v1282_v41 }
  0xc8   :  { %v844_v46 = vpop.f32.mrf.mxu0  ;;  %v991_v47 = vpop.f32.mrf.mxu1 }
  0xc9   :  { %v1566_v50 = vadd.f32 %v2227_v14, %v1431_v45  ;;  %1832 = vmatmul.msk.f32.gmra.mxu2 %vm214_vm0, %v136_v43  ;;  %v1432_v51 = vmax.f32 %v844_v46, %v991_v47  ;;  %1881 = vmatmul.msk.f32.gmra.mxu3 %vm214_vm0, %v185_v44  ;;  %v141_v45 = vld [vmem:[%s2943_s0 + $0x3f8] sm:$0xff]  ;;  %v190_v46 = vld [vmem:[%s2943_s0 + $0x580] sm:$0xff] }
  0xcb   :  { %v1615_v52 = vmax.f32 %v1566_v50, 0.0  ;;  %1734 = vmatmul.msk.f32.gmra.mxu0 %vm214_vm0, %v38_v48  ;;  %1783 = vmatmul.msk.f32.gmra.mxu1 %vm214_vm0, %v87_v49  ;;  %v43_v50 = vld [vmem:[%s2943_s0 + $0xe8] sm:$0xff] }
  0xcc   :  { %v1138_v53 = vpop.f32.mrf.mxu2  ;;  %v1285_v54 = vpop.f32.mrf.mxu3 }
  0xcd   :  { %1664 = vst [vmem:[%s2945_s3 + $0x38] sm:$0xff] %v1615_v52  ;;  %v1433_v55 = vmax.f32 %v1432_v51, %v1138_v53  ;;  %v92_v51 = vld [vmem:[%s2943_s0 + $0x270] sm:$0xff] }
  0xcf   :  { %v1434_v58 = vmax.f32 %v1433_v55, %v1285_v54 }
  0xd0   :  { %v847_v59 = vpop.f32.mrf.mxu0  ;;  %v994_v60 = vpop.f32.mrf.mxu1 }
  0xd1   :  { %v1567_v63 = vadd.f32 %v2227_v14, %v1434_v58  ;;  %1833 = vmatmul.msk.f32.gmra.mxu2 %vm214_vm0, %v137_v56  ;;  %v1435_v0 = vmax.f32 %v847_v59, %v994_v60  ;;  %1882 = vmatmul.msk.f32.gmra.mxu3 %vm214_vm0, %v186_v57  ;;  %v142_v58 = vld [vmem:[%s2943_s0 + $0x400] sm:$0xff]  ;;  %v191_v59 = vld [vmem:[%s2943_s0 + $0x588] sm:$0xff] }
  0xd3   :  { %v1616_v1 = vmax.f32 %v1567_v63, 0.0  ;;  %1735 = vmatmul.msk.f32.gmra.mxu0 %vm214_vm0, %v39_v61  ;;  %1784 = vmatmul.msk.f32.gmra.mxu1 %vm214_vm0, %v88_v62  ;;  %v44_v63 = vld [vmem:[%s2943_s0 + $0xf0] sm:$0xff] }
  0xd4   :  { %v1141_v2 = vpop.f32.mrf.mxu2  ;;  %v1288_v3 = vpop.f32.mrf.mxu3 }
  0xd5   :  { %1665 = vst [vmem:[%s2945_s3 + $0x40] sm:$0xff] %v1616_v1  ;;  %v1436_v4 = vmax.f32 %v1435_v0, %v1141_v2  ;;  %v93_v0 = vld [vmem:[%s2943_s0 + $0x278] sm:$0xff] }
  0xd7   :  { %v1437_v7 = vmax.f32 %v1436_v4, %v1288_v3 }
  0xd8   :  { %v850_v8 = vpop.f32.mrf.mxu0  ;;  %v997_v9 = vpop.f32.mrf.mxu1 }
  0xd9   :  { %v1568_v12 = vadd.f32 %v2227_v14, %v1437_v7  ;;  %1834 = vmatmul.msk.f32.gmra.mxu2 %vm214_vm0, %v138_v5  ;;  %v1438_v13 = vmax.f32 %v850_v8, %v997_v9  ;;  %1883 = vmatmul.msk.f32.gmra.mxu3 %vm214_vm0, %v187_v6  ;;  %v143_v7 = vld [vmem:[%s2943_s0 + $0x408] sm:$0xff]  ;;  %v192_v8 = vld [vmem:[%s2943_s0 + $0x590] sm:$0xff] }
  0xdb   :  { %v1617_v15 = vmax.f32 %v1568_v12, 0.0  ;;  %1736 = vmatmul.msk.f32.gmra.mxu0 %vm214_vm0, %v40_v10  ;;  %1785 = vmatmul.msk.f32.gmra.mxu1 %vm214_vm0, %v89_v11  ;;  %v45_v12 = vld [vmem:[%s2943_s0 + $0xf8] sm:$0xff] }
  0xdc   :  { %v1144_v16 = vpop.f32.mrf.mxu2  ;;  %v1291_v17 = vpop.f32.mrf.mxu3 }
  0xdd   :  { %1666 = vst [vmem:[%s2945_s3 + $0x48] sm:$0xff] %v1617_v15  ;;  %v1439_v18 = vmax.f32 %v1438_v13, %v1144_v16  ;;  %v94_v13 = vld [vmem:[%s2943_s0 + $0x280] sm:$0xff] }
  0xdf   :  { %v1440_v21 = vmax.f32 %v1439_v18, %v1291_v17 }
  0xe0   :  { %v853_v22 = vpop.f32.mrf.mxu0  ;;  %v1000_v23 = vpop.f32.mrf.mxu1 }
  0xe1   :  { %v1569_v26 = vadd.f32 %v2227_v14, %v1440_v21  ;;  %1835 = vmatmul.msk.f32.gmra.mxu2 %vm214_vm0, %v139_v19  ;;  %v1441_v27 = vmax.f32 %v853_v22, %v1000_v23  ;;  %1884 = vmatmul.msk.f32.gmra.mxu3 %vm214_vm0, %v188_v20  ;;  %v144_v21 = vld [vmem:[%s2943_s0 + $0x410] sm:$0xff]  ;;  %v193_v22 = vld [vmem:[%s2943_s0 + $0x598] sm:$0xff] }
  0xe3   :  { %v1618_v28 = vmax.f32 %v1569_v26, 0.0  ;;  %1737 = vmatmul.msk.f32.gmra.mxu0 %vm214_vm0, %v41_v24  ;;  %1786 = vmatmul.msk.f32.gmra.mxu1 %vm214_vm0, %v90_v25  ;;  %v46_v26 = vld [vmem:[%s2943_s0 + $0x100] sm:$0xff] }
  0xe4   :  { %v1147_v29 = vpop.f32.mrf.mxu2  ;;  %v1294_v30 = vpop.f32.mrf.mxu3 }
  0xe5   :  { %1667 = vst [vmem:[%s2945_s3 + $0x50] sm:$0xff] %v1618_v28  ;;  %v1442_v31 = vmax.f32 %v1441_v27, %v1147_v29  ;;  %v95_v27 = vld [vmem:[%s2943_s0 + $0x288] sm:$0xff] }
  0xe7   :  { %v1443_v34 = vmax.f32 %v1442_v31, %v1294_v30 }
  0xe8   :  { %v856_v35 = vpop.f32.mrf.mxu0  ;;  %v1003_v36 = vpop.f32.mrf.mxu1 }
  0xe9   :  { %v1570_v39 = vadd.f32 %v2227_v14, %v1443_v34  ;;  %1836 = vmatmul.msk.f32.gmra.mxu2 %vm214_vm0, %v140_v32  ;;  %v1444_v40 = vmax.f32 %v856_v35, %v1003_v36  ;;  %1885 = vmatmul.msk.f32.gmra.mxu3 %vm214_vm0, %v189_v33  ;;  %v145_v34 = vld [vmem:[%s2943_s0 + $0x418] sm:$0xff]  ;;  %v194_v35 = vld [vmem:[%s2943_s0 + $0x5a0] sm:$0xff] }
  0xeb   :  { %v1619_v41 = vmax.f32 %v1570_v39, 0.0  ;;  %1738 = vmatmul.msk.f32.gmra.mxu0 %vm214_vm0, %v42_v37  ;;  %1787 = vmatmul.msk.f32.gmra.mxu1 %vm214_vm0, %v91_v38  ;;  %v47_v39 = vld [vmem:[%s2943_s0 + $0x108] sm:$0xff] }
  0xec   :  { %v1150_v42 = vpop.f32.mrf.mxu2  ;;  %v1297_v43 = vpop.f32.mrf.mxu3 }
  0xed   :  { %1668 = vst [vmem:[%s2945_s3 + $0x58] sm:$0xff] %v1619_v41  ;;  %v1445_v44 = vmax.f32 %v1444_v40, %v1150_v42  ;;  %v96_v40 = vld [vmem:[%s2943_s0 + $0x290] sm:$0xff] }
  0xef   :  { %v1446_v47 = vmax.f32 %v1445_v44, %v1297_v43 }
  0xf0   :  { %v859_v48 = vpop.f32.mrf.mxu0  ;;  %v1006_v49 = vpop.f32.mrf.mxu1 }
  0xf1   :  { %v1571_v52 = vadd.f32 %v2227_v14, %v1446_v47  ;;  %1837 = vmatmul.msk.f32.gmra.mxu2 %vm214_vm0, %v141_v45  ;;  %v1447_v53 = vmax.f32 %v859_v48, %v1006_v49  ;;  %1886 = vmatmul.msk.f32.gmra.mxu3 %vm214_vm0, %v190_v46  ;;  %v146_v47 = vld [vmem:[%s2943_s0 + $0x420] sm:$0xff]  ;;  %v195_v48 = vld [vmem:[%s2943_s0 + $0x5a8] sm:$0xff] }
  0xf3   :  { %v1620_v54 = vmax.f32 %v1571_v52, 0.0  ;;  %1739 = vmatmul.msk.f32.gmra.mxu0 %vm214_vm0, %v43_v50  ;;  %1788 = vmatmul.msk.f32.gmra.mxu1 %vm214_vm0, %v92_v51  ;;  %v48_v52 = vld [vmem:[%s2943_s0 + $0x110] sm:$0xff] }
  0xf4   :  { %v1153_v55 = vpop.f32.mrf.mxu2  ;;  %v1300_v56 = vpop.f32.mrf.mxu3 }
  0xf5   :  { %1669 = vst [vmem:[%s2945_s3 + $0x60] sm:$0xff] %v1620_v54  ;;  %v1448_v57 = vmax.f32 %v1447_v53, %v1153_v55  ;;  %v97_v53 = vld [vmem:[%s2943_s0 + $0x298] sm:$0xff] }
  0xf7   :  { %v1449_v60 = vmax.f32 %v1448_v57, %v1300_v56 }
  0xf8   :  { %v862_v61 = vpop.f32.mrf.mxu0  ;;  %v1009_v62 = vpop.f32.mrf.mxu1 }
  0xf9   :  { %v1572_v1 = vadd.f32 %v2227_v14, %v1449_v60  ;;  %1838 = vmatmul.msk.f32.gmra.mxu2 %vm214_vm0, %v142_v58  ;;  %v1450_v2 = vmax.f32 %v862_v61, %v1009_v62  ;;  %1887 = vmatmul.msk.f32.gmra.mxu3 %vm214_vm0, %v191_v59  ;;  %v147_v60 = vld [vmem:[%s2943_s0 + $0x428] sm:$0xff]  ;;  %v196_v61 = vld [vmem:[%s2943_s0 + $0x5b0] sm:$0xff] }
  0xfb   :  { %v1621_v3 = vmax.f32 %v1572_v1, 0.0  ;;  %1740 = vmatmul.msk.f32.gmra.mxu0 %vm214_vm0, %v44_v63  ;;  %1789 = vmatmul.msk.f32.gmra.mxu1 %vm214_vm0, %v93_v0  ;;  %v49_v1 = vld [vmem:[%s2943_s0 + $0x118] sm:$0xff] }
  0xfc   :  { %v1156_v4 = vpop.f32.mrf.mxu2  ;;  %v1303_v5 = vpop.f32.mrf.mxu3 }
  0xfd   :  { %1670 = vst [vmem:[%s2945_s3 + $0x68] sm:$0xff] %v1621_v3  ;;  %v1451_v6 = vmax.f32 %v1450_v2, %v1156_v4  ;;  %v98_v2 = vld [vmem:[%s2943_s0 + $0x2a0] sm:$0xff] }
  0xff   :  { %v1452_v9 = vmax.f32 %v1451_v6, %v1303_v5 }
 0x100   :  { %v865_v10 = vpop.f32.mrf.mxu0  ;;  %v1012_v11 = vpop.f32.mrf.mxu1 }
 0x101   :  { %v1573_v15 = vadd.f32 %v2227_v14, %v1452_v9  ;;  %1839 = vmatmul.msk.f32.gmra.mxu2 %vm214_vm0, %v143_v7  ;;  %v1453_v16 = vmax.f32 %v865_v10, %v1012_v11  ;;  %1888 = vmatmul.msk.f32.gmra.mxu3 %vm214_vm0, %v192_v8  ;;  %v148_v9 = vld [vmem:[%s2943_s0 + $0x430] sm:$0xff]  ;;  %v197_v10 = vld [vmem:[%s2943_s0 + $0x5b8] sm:$0xff] }
 0x103   :  { %v1622_v17 = vmax.f32 %v1573_v15, 0.0  ;;  %1741 = vmatmul.msk.f32.gmra.mxu0 %vm214_vm0, %v45_v12  ;;  %1790 = vmatmul.msk.f32.gmra.mxu1 %vm214_vm0, %v94_v13  ;;  %v50_v15 = vld [vmem:[%s2943_s0 + $0x120] sm:$0xff] }
 0x104   :  { %v1159_v18 = vpop.f32.mrf.mxu2  ;;  %v1306_v19 = vpop.f32.mrf.mxu3 }
 0x105   :  { %1671 = vst [vmem:[%s2945_s3 + $0x70] sm:$0xff] %v1622_v17  ;;  %v1454_v20 = vmax.f32 %v1453_v16, %v1159_v18  ;;  %v99_v16 = vld [vmem:[%s2943_s0 + $0x2a8] sm:$0xff] }
 0x107   :  { %v1455_v23 = vmax.f32 %v1454_v20, %v1306_v19 }
 0x108   :  { %v868_v24 = vpop.f32.mrf.mxu0  ;;  %v1015_v25 = vpop.f32.mrf.mxu1 }
 0x109   :  { %v1574_v28 = vadd.f32 %v2227_v14, %v1455_v23  ;;  %1840 = vmatmul.msk.f32.gmra.mxu2 %vm214_vm0, %v144_v21  ;;  %v1456_v29 = vmax.f32 %v868_v24, %v1015_v25  ;;  %1889 = vmatmul.msk.f32.gmra.mxu3 %vm214_vm0, %v193_v22  ;;  %v149_v23 = vld [vmem:[%s2943_s0 + $0x438] sm:$0xff]  ;;  %v198_v24 = vld [vmem:[%s2943_s0 + $0x5c0] sm:$0xff] }
 0x10b   :  { %v1623_v30 = vmax.f32 %v1574_v28, 0.0  ;;  %1742 = vmatmul.msk.f32.gmra.mxu0 %vm214_vm0, %v46_v26  ;;  %1791 = vmatmul.msk.f32.gmra.mxu1 %vm214_vm0, %v95_v27  ;;  %v51_v28 = vld [vmem:[%s2943_s0 + $0x128] sm:$0xff] }
 0x10c   :  { %v1162_v31 = vpop.f32.mrf.mxu2  ;;  %v1309_v32 = vpop.f32.mrf.mxu3 }
 0x10d   :  { %1672 = vst [vmem:[%s2945_s3 + $0x78] sm:$0xff] %v1623_v30  ;;  %v1457_v33 = vmax.f32 %v1456_v29, %v1162_v31  ;;  %v100_v29 = vld [vmem:[%s2943_s0 + $0x2b0] sm:$0xff] }
 0x10f   :  { %v1458_v36 = vmax.f32 %v1457_v33, %v1309_v32 }
 0x110   :  { %v871_v37 = vpop.f32.mrf.mxu0  ;;  %v1018_v38 = vpop.f32.mrf.mxu1 }
 0x111   :  { %v1575_v41 = vadd.f32 %v2227_v14, %v1458_v36  ;;  %1841 = vmatmul.msk.f32.gmra.mxu2 %vm214_vm0, %v145_v34  ;;  %v1459_v42 = vmax.f32 %v871_v37, %v1018_v38  ;;  %1890 = vmatmul.msk.f32.gmra.mxu3 %vm214_vm0, %v194_v35  ;;  %v150_v36 = vld [vmem:[%s2943_s0 + $0x440] sm:$0xff]  ;;  %v199_v37 = vld [vmem:[%s2943_s0 + $0x5c8] sm:$0xff] }
 0x113   :  { %v1624_v43 = vmax.f32 %v1575_v41, 0.0  ;;  %1743 = vmatmul.msk.f32.gmra.mxu0 %vm214_vm0, %v47_v39  ;;  %1792 = vmatmul.msk.f32.gmra.mxu1 %vm214_vm0, %v96_v40  ;;  %v52_v41 = vld [vmem:[%s2943_s0 + $0x130] sm:$0xff] }
 0x114   :  { %v1165_v44 = vpop.f32.mrf.mxu2  ;;  %v1312_v45 = vpop.f32.mrf.mxu3 }
 0x115   :  { %1673 = vst [vmem:[%s2945_s3 + $0x80] sm:$0xff] %v1624_v43  ;;  %v1460_v46 = vmax.f32 %v1459_v42, %v1165_v44  ;;  %v101_v42 = vld [vmem:[%s2943_s0 + $0x2b8] sm:$0xff] }
 0x117   :  { %v1461_v49 = vmax.f32 %v1460_v46, %v1312_v45 }
 0x118   :  { %v874_v50 = vpop.f32.mrf.mxu0  ;;  %v1021_v51 = vpop.f32.mrf.mxu1 }
 0x119   :  { %v1576_v54 = vadd.f32 %v2227_v14, %v1461_v49  ;;  %1842 = vmatmul.msk.f32.gmra.mxu2 %vm214_vm0, %v146_v47  ;;  %v1462_v55 = vmax.f32 %v874_v50, %v1021_v51  ;;  %1891 = vmatmul.msk.f32.gmra.mxu3 %vm214_vm0, %v195_v48  ;;  %v151_v49 = vld [vmem:[%s2943_s0 + $0x448] sm:$0xff]  ;;  %v200_v50 = vld [vmem:[%s2943_s0 + $0x5d0] sm:$0xff] }
 0x11b   :  { %v1625_v56 = vmax.f32 %v1576_v54, 0.0  ;;  %1744 = vmatmul.msk.f32.gmra.mxu0 %vm214_vm0, %v48_v52  ;;  %1793 = vmatmul.msk.f32.gmra.mxu1 %vm214_vm0, %v97_v53  ;;  %v53_v54 = vld [vmem:[%s2943_s0 + $0x138] sm:$0xff] }
 0x11c   :  { %v1168_v57 = vpop.f32.mrf.mxu2  ;;  %v1315_v58 = vpop.f32.mrf.mxu3 }
 0x11d   :  { %1674 = vst [vmem:[%s2945_s3 + $0x88] sm:$0xff] %v1625_v56  ;;  %v1463_v59 = vmax.f32 %v1462_v55, %v1168_v57  ;;  %v102_v55 = vld [vmem:[%s2943_s0 + $0x2c0] sm:$0xff] }
 0x11f   :  { %v1464_v62 = vmax.f32 %v1463_v59, %v1315_v58 }
 0x120   :  { %v877_v63 = vpop.f32.mrf.mxu0  ;;  %v1024_v0 = vpop.f32.mrf.mxu1 }
 0x121   :  { %v1577_v3 = vadd.f32 %v2227_v14, %v1464_v62  ;;  %1843 = vmatmul.msk.f32.gmra.mxu2 %vm214_vm0, %v147_v60  ;;  %v1465_v4 = vmax.f32 %v877_v63, %v1024_v0  ;;  %1892 = vmatmul.msk.f32.gmra.mxu3 %vm214_vm0, %v196_v61  ;;  %v152_v62 = vld [vmem:[%s2943_s0 + $0x450] sm:$0xff]  ;;  %v201_v63 = vld [vmem:[%s2943_s0 + $0x5d8] sm:$0xff] }
 0x123   :  { %v1626_v5 = vmax.f32 %v1577_v3, 0.0  ;;  %1745 = vmatmul.msk.f32.gmra.mxu0 %vm214_vm0, %v49_v1  ;;  %1794 = vmatmul.msk.f32.gmra.mxu1 %vm214_vm0, %v98_v2  ;;  %v54_v3 = vld [vmem:[%s2943_s0 + $0x140] sm:$0xff] }
 0x124   :  { %v1171_v6 = vpop.f32.mrf.mxu2  ;;  %v1318_v7 = vpop.f32.mrf.mxu3 }
 0x125   :  { %1675 = vst [vmem:[%s2945_s3 + $0x90] sm:$0xff] %v1626_v5  ;;  %v1466_v8 = vmax.f32 %v1465_v4, %v1171_v6  ;;  %v103_v4 = vld [vmem:[%s2943_s0 + $0x2c8] sm:$0xff] }
 0x127   :  { %v1467_v11 = vmax.f32 %v1466_v8, %v1318_v7 }
 0x128   :  { %v880_v12 = vpop.f32.mrf.mxu0  ;;  %v1027_v13 = vpop.f32.mrf.mxu1 }
 0x129   :  { %v1578_v17 = vadd.f32 %v2227_v14, %v1467_v11  ;;  %1844 = vmatmul.msk.f32.gmra.mxu2 %vm214_vm0, %v148_v9  ;;  %v1468_v18 = vmax.f32 %v880_v12, %v1027_v13  ;;  %1893 = vmatmul.msk.f32.gmra.mxu3 %vm214_vm0, %v197_v10  ;;  %v153_v11 = vld [vmem:[%s2943_s0 + $0x458] sm:$0xff]  ;;  %v202_v12 = vld [vmem:[%s2943_s0 + $0x5e0] sm:$0xff] }
 0x12b   :  { %v1627_v19 = vmax.f32 %v1578_v17, 0.0  ;;  %1746 = vmatmul.msk.f32.gmra.mxu0 %vm214_vm0, %v50_v15  ;;  %1795 = vmatmul.msk.f32.gmra.mxu1 %vm214_vm0, %v99_v16  ;;  %v55_v17 = vld [vmem:[%s2943_s0 + $0x148] sm:$0xff] }
 0x12c   :  { %v1174_v20 = vpop.f32.mrf.mxu2  ;;  %v1321_v21 = vpop.f32.mrf.mxu3 }
 0x12d   :  { %1676 = vst [vmem:[%s2945_s3 + $0x98] sm:$0xff] %v1627_v19  ;;  %v1469_v22 = vmax.f32 %v1468_v18, %v1174_v20  ;;  %v104_v18 = vld [vmem:[%s2943_s0 + $0x2d0] sm:$0xff] }
 0x12f   :  { %v1470_v25 = vmax.f32 %v1469_v22, %v1321_v21 }
 0x130   :  { %v883_v26 = vpop.f32.mrf.mxu0  ;;  %v1030_v27 = vpop.f32.mrf.mxu1 }
 0x131   :  { %v1579_v30 = vadd.f32 %v2227_v14, %v1470_v25  ;;  %1845 = vmatmul.msk.f32.gmra.mxu2 %vm214_vm0, %v149_v23  ;;  %v1471_v31 = vmax.f32 %v883_v26, %v1030_v27  ;;  %1894 = vmatmul.msk.f32.gmra.mxu3 %vm214_vm0, %v198_v24  ;;  %v154_v25 = vld [vmem:[%s2943_s0 + $0x460] sm:$0xff]  ;;  %v203_v26 = vld [vmem:[%s2943_s0 + $0x5e8] sm:$0xff] }
 0x133   :  { %v1628_v32 = vmax.f32 %v1579_v30, 0.0  ;;  %1747 = vmatmul.msk.f32.gmra.mxu0 %vm214_vm0, %v51_v28  ;;  %1796 = vmatmul.msk.f32.gmra.mxu1 %vm214_vm0, %v100_v29  ;;  %v56_v30 = vld [vmem:[%s2943_s0 + $0x150] sm:$0xff] }
 0x134   :  { %v1177_v33 = vpop.f32.mrf.mxu2  ;;  %v1324_v34 = vpop.f32.mrf.mxu3 }
 0x135   :  { %1677 = vst [vmem:[%s2945_s3 + $0xa0] sm:$0xff] %v1628_v32  ;;  %v1472_v35 = vmax.f32 %v1471_v31, %v1177_v33  ;;  %v105_v31 = vld [vmem:[%s2943_s0 + $0x2d8] sm:$0xff] }
 0x137   :  { %v1473_v38 = vmax.f32 %v1472_v35, %v1324_v34 }
 0x138   :  { %v886_v39 = vpop.f32.mrf.mxu0  ;;  %v1033_v40 = vpop.f32.mrf.mxu1 }
 0x139   :  { %v1580_v43 = vadd.f32 %v2227_v14, %v1473_v38  ;;  %1846 = vmatmul.msk.f32.gmra.mxu2 %vm214_vm0, %v150_v36  ;;  %v1474_v44 = vmax.f32 %v886_v39, %v1033_v40  ;;  %1895 = vmatmul.msk.f32.gmra.mxu3 %vm214_vm0, %v199_v37  ;;  %v155_v38 = vld [vmem:[%s2943_s0 + $0x468] sm:$0xff]  ;;  %v204_v39 = vld [vmem:[%s2943_s0 + $0x5f0] sm:$0xff] }
 0x13b   :  { %v1629_v45 = vmax.f32 %v1580_v43, 0.0  ;;  %1748 = vmatmul.msk.f32.gmra.mxu0 %vm214_vm0, %v52_v41  ;;  %1797 = vmatmul.msk.f32.gmra.mxu1 %vm214_vm0, %v101_v42  ;;  %v57_v43 = vld [vmem:[%s2943_s0 + $0x158] sm:$0xff] }
 0x13c   :  { %v1180_v46 = vpop.f32.mrf.mxu2  ;;  %v1327_v47 = vpop.f32.mrf.mxu3 }
 0x13d   :  { %1678 = vst [vmem:[%s2945_s3 + $0xa8] sm:$0xff] %v1629_v45  ;;  %v1475_v48 = vmax.f32 %v1474_v44, %v1180_v46  ;;  %v106_v44 = vld [vmem:[%s2943_s0 + $0x2e0] sm:$0xff] }
 0x13f   :  { %v1476_v51 = vmax.f32 %v1475_v48, %v1327_v47 }
 0x140   :  { %v889_v52 = vpop.f32.mrf.mxu0  ;;  %v1036_v53 = vpop.f32.mrf.mxu1 }
 0x141   :  { %v1581_v56 = vadd.f32 %v2227_v14, %v1476_v51  ;;  %1847 = vmatmul.msk.f32.gmra.mxu2 %vm214_vm0, %v151_v49  ;;  %v1477_v57 = vmax.f32 %v889_v52, %v1036_v53  ;;  %1896 = vmatmul.msk.f32.gmra.mxu3 %vm214_vm0, %v200_v50  ;;  %v156_v51 = vld [vmem:[%s2943_s0 + $0x470] sm:$0xff]  ;;  %v205_v52 = vld [vmem:[%s2943_s0 + $0x5f8] sm:$0xff] }
 0x143   :  { %v1630_v58 = vmax.f32 %v1581_v56, 0.0  ;;  %1749 = vmatmul.msk.f32.gmra.mxu0 %vm214_vm0, %v53_v54  ;;  %1798 = vmatmul.msk.f32.gmra.mxu1 %vm214_vm0, %v102_v55  ;;  %v58_v56 = vld [vmem:[%s2943_s0 + $0x160] sm:$0xff] }
 0x144   :  { %v1183_v59 = vpop.f32.mrf.mxu2  ;;  %v1330_v60 = vpop.f32.mrf.mxu3 }
 0x145   :  { %1679 = vst [vmem:[%s2945_s3 + $0xb0] sm:$0xff] %v1630_v58  ;;  %v1478_v61 = vmax.f32 %v1477_v57, %v1183_v59  ;;  %v107_v57 = vld [vmem:[%s2943_s0 + $0x2e8] sm:$0xff] }
 0x147   :  { %v1479_v0 = vmax.f32 %v1478_v61, %v1330_v60 }
 0x148   :  { %v892_v1 = vpop.f32.mrf.mxu0  ;;  %v1039_v2 = vpop.f32.mrf.mxu1 }
 0x149   :  { %v1582_v5 = vadd.f32 %v2227_v14, %v1479_v0  ;;  %1848 = vmatmul.msk.f32.gmra.mxu2 %vm214_vm0, %v152_v62  ;;  %v1480_v6 = vmax.f32 %v892_v1, %v1039_v2  ;;  %1897 = vmatmul.msk.f32.gmra.mxu3 %vm214_vm0, %v201_v63  ;;  %v206_v0 = vld [vmem:[%s2943_s0 + $0x600] sm:$0xff] }
 0x14b   :  { %v1631_v7 = vmax.f32 %v1582_v5, 0.0  ;;  %1750 = vmatmul.msk.f32.gmra.mxu0 %vm214_vm0, %v54_v3  ;;  %1799 = vmatmul.msk.f32.gmra.mxu1 %vm214_vm0, %v103_v4  ;;  %v59_v4 = vld [vmem:[%s2943_s0 + $0x168] sm:$0xff]  ;;  %v108_v5 = vld [vmem:[%s2943_s0 + $0x2f0] sm:$0xff] }
 0x14c   :  { %v1186_v8 = vpop.f32.mrf.mxu2  ;;  %v1333_v9 = vpop.f32.mrf.mxu3 }
 0x14d   :  { %1680 = vst [vmem:[%s2945_s3 + $0xb8] sm:$0xff] %v1631_v7  ;;  %v1481_v10 = vmax.f32 %v1480_v6, %v1186_v8  ;;  %v2804_v6 = vld [vmem:[%s2944_s2] ss:$0 sm:$0xff] }
 0x14f   :  { %v1482_v13 = vmax.f32 %v1481_v10, %v1333_v9 }
 0x150   :  { %v895_v15 = vpop.f32.mrf.mxu0  ;;  %v1042_v16 = vpop.f32.mrf.mxu1 }
 0x151   :  { %v1583_v19 = vadd.f32 %v2227_v14, %v1482_v13  ;;  %1849 = vmatmul.msk.f32.gmra.mxu2 %vm214_vm0, %v153_v11  ;;  %v1483_v20 = vmax.f32 %v895_v15, %v1042_v16  ;;  %1898 = vmatmul.msk.f32.gmra.mxu3 %vm214_vm0, %v202_v12  ;;  %v158_v13 = vld [vmem:[%s2943_s0 + $0x480] sm:$0xff]  ;;  %v207_v15 = vld [vmem:[%s2943_s0 + $0x608] sm:$0xff] }
 0x153   :  { %v1632_v21 = vmax.f32 %v1583_v19, 0.0  ;;  %1751 = vmatmul.msk.f32.gmra.mxu0 %vm214_vm0, %v55_v17  ;;  %1800 = vmatmul.msk.f32.gmra.mxu1 %vm214_vm0, %v104_v18  ;;  %v60_v19 = vld [vmem:[%s2943_s0 + $0x170] sm:$0xff] }
 0x154   :  { %v1189_v22 = vpop.f32.mrf.mxu2  ;;  %v1336_v23 = vpop.f32.mrf.mxu3 }
 0x155   :  { %1681 = vst [vmem:[%s2945_s3 + $0xc0] sm:$0xff] %v1632_v21  ;;  %v1484_v24 = vmax.f32 %v1483_v20, %v1189_v22  ;;  %v109_v20 = vld [vmem:[%s2943_s0 + $0x2f8] sm:$0xff] }
 0x157   :  { %v1485_v27 = vmax.f32 %v1484_v24, %v1336_v23 }
 0x158   :  { %v898_v28 = vpop.f32.mrf.mxu0  ;;  %v1045_v29 = vpop.f32.mrf.mxu1 }
 0x159   :  { %v1584_v32 = vadd.f32 %v2227_v14, %v1485_v27  ;;  %1850 = vmatmul.msk.f32.gmra.mxu2 %vm214_vm0, %v154_v25  ;;  %v1486_v33 = vmax.f32 %v898_v28, %v1045_v29  ;;  %1899 = vmatmul.msk.f32.gmra.mxu3 %vm214_vm0, %v203_v26  ;;  %v159_v27 = vld [vmem:[%s2943_s0 + $0x488] sm:$0xff]  ;;  %v208_v28 = vld [vmem:[%s2943_s0 + $0x610] sm:$0xff] }
 0x15b   :  { %v1633_v34 = vmax.f32 %v1584_v32, 0.0  ;;  %1752 = vmatmul.msk.f32.gmra.mxu0 %vm214_vm0, %v56_v30  ;;  %1801 = vmatmul.msk.f32.gmra.mxu1 %vm214_vm0, %v105_v31  ;;  %v61_v32 = vld [vmem:[%s2943_s0 + $0x178] sm:$0xff] }
 0x15c   :  { %v1192_v35 = vpop.f32.mrf.mxu2  ;;  %v1339_v36 = vpop.f32.mrf.mxu3 }
 0x15d   :  { %1682 = vst [vmem:[%s2945_s3 + $0xc8] sm:$0xff] %v1633_v34  ;;  %v1487_v37 = vmax.f32 %v1486_v33, %v1192_v35  ;;  %v110_v33 = vld [vmem:[%s2943_s0 + $0x300] sm:$0xff] }
 0x15f   :  { %v1488_v40 = vmax.f32 %v1487_v37, %v1339_v36 }
 0x160   :  { %v901_v41 = vpop.f32.mrf.mxu0  ;;  %v1048_v42 = vpop.f32.mrf.mxu1 }
 0x161   :  { %v1585_v45 = vadd.f32 %v2227_v14, %v1488_v40  ;;  %1851 = vmatmul.msk.f32.gmra.mxu2 %vm214_vm0, %v155_v38  ;;  %v1489_v46 = vmax.f32 %v901_v41, %v1048_v42  ;;  %1900 = vmatmul.msk.f32.gmra.mxu3 %vm214_vm0, %v204_v39  ;;  %v160_v40 = vld [vmem:[%s2943_s0 + $0x490] sm:$0xff]  ;;  %v209_v41 = vld [vmem:[%s2943_s0 + $0x618] sm:$0xff] }
 0x163   :  { %v1634_v47 = vmax.f32 %v1585_v45, 0.0  ;;  %1753 = vmatmul.msk.f32.gmra.mxu0 %vm214_vm0, %v57_v43  ;;  %1802 = vmatmul.msk.f32.gmra.mxu1 %vm214_vm0, %v106_v44  ;;  %v62_v45 = vld [vmem:[%s2943_s0 + $0x180] sm:$0xff] }
 0x164   :  { %v1195_v48 = vpop.f32.mrf.mxu2  ;;  %v1342_v49 = vpop.f32.mrf.mxu3 }
 0x165   :  { %1683 = vst [vmem:[%s2945_s3 + $0xd0] sm:$0xff] %v1634_v47  ;;  %v1490_v50 = vmax.f32 %v1489_v46, %v1195_v48  ;;  %v111_v46 = vld [vmem:[%s2943_s0 + $0x308] sm:$0xff] }
 0x167   :  { %v1491_v53 = vmax.f32 %v1490_v50, %v1342_v49 }
 0x168   :  { %v904_v54 = vpop.f32.mrf.mxu0  ;;  %v1051_v55 = vpop.f32.mrf.mxu1 }
 0x169   :  { %v1586_v58 = vadd.f32 %v2227_v14, %v1491_v53  ;;  %1852 = vmatmul.msk.f32.gmra.mxu2 %vm214_vm0, %v156_v51  ;;  %v1492_v59 = vmax.f32 %v904_v54, %v1051_v55  ;;  %1901 = vmatmul.msk.f32.gmra.mxu3 %vm214_vm0, %v205_v52  ;;  %v157_v14 = vld [vmem:[%s2943_s0 + $0x478] sm:$0xff] }
 0x16b   :  { %v1635_v60 = vmax.f32 %v1586_v58, 0.0  ;;  %1754 = vmatmul.msk.f32.gmra.mxu0 %vm214_vm0, %v58_v56  ;;  %1803 = vmatmul.msk.f32.gmra.mxu1 %vm214_vm0, %v107_v57 }
 0x16c   :  { %v1198_v61 = vpop.f32.mrf.mxu2  ;;  %v1345_v62 = vpop.f32.mrf.mxu3 }
 0x16d   :  { %1684 = vst [vmem:[%s2945_s3 + $0xd8] sm:$0xff] %v1635_v60  ;;  %v1493_v63 = vmax.f32 %v1492_v59, %v1198_v61 }
 0x16f   :  { %v1494_v1 = vmax.f32 %v1493_v63, %v1345_v62 }
 0x170   :  { %v907_v2 = vpop.f32.mrf.mxu0  ;;  %v1054_v3 = vpop.f32.mrf.mxu1 }
 0x171   :  { %v1587_v7 = vadd.f32 %v2804_v6, %v1494_v1  ;;  %1853 = vmatmul.msk.f32.gmra.mxu2 %vm214_vm0, %v157_v14  ;;  %v1495_v8 = vmax.f32 %v907_v2, %v1054_v3  ;;  %1902 = vmatmul.msk.f32.gmra.mxu3 %vm214_vm0, %v206_v0 }
 0x173   :  { %v1636_v9 = vmax.f32 %v1587_v7, 0.0  ;;  %1755 = vmatmul.msk.f32.gmra.mxu0 %vm214_vm0, %v59_v4  ;;  %1804 = vmatmul.msk.f32.gmra.mxu1 %vm214_vm0, %v108_v5 }
 0x174   :  { %v1201_v10 = vpop.f32.mrf.mxu2  ;;  %v1348_v11 = vpop.f32.mrf.mxu3 }
 0x175   :  { %1685 = vst [vmem:[%s2945_s3 + $0xe0] sm:$0xff] %v1636_v9  ;;  %v1496_v12 = vmax.f32 %v1495_v8, %v1201_v10 }
 0x177   :  { %v1497_v16 = vmax.f32 %v1496_v12, %v1348_v11 }
 0x178   :  { %v910_v17 = vpop.f32.mrf.mxu0  ;;  %v1057_v18 = vpop.f32.mrf.mxu1 }
 0x179   :  { %v1588_v21 = vadd.f32 %v2804_v6, %v1497_v16  ;;  %1854 = vmatmul.msk.f32.gmra.mxu2 %vm214_vm0, %v158_v13  ;;  %v1498_v22 = vmax.f32 %v910_v17, %v1057_v18  ;;  %1903 = vmatmul.msk.f32.gmra.mxu3 %vm214_vm0, %v207_v15 }
 0x17b   :  { %v1637_v23 = vmax.f32 %v1588_v21, 0.0  ;;  %1756 = vmatmul.msk.f32.gmra.mxu0 %vm214_vm0, %v60_v19  ;;  %1805 = vmatmul.msk.f32.gmra.mxu1 %vm214_vm0, %v109_v20 }
 0x17c   :  { %v1204_v24 = vpop.f32.mrf.mxu2  ;;  %v1351_v25 = vpop.f32.mrf.mxu3 }
 0x17d   :  { %1686 = vst [vmem:[%s2945_s3 + $0xe8] sm:$0xff] %v1637_v23  ;;  %v1499_v26 = vmax.f32 %v1498_v22, %v1204_v24 }
 0x17f   :  { %v1500_v29 = vmax.f32 %v1499_v26, %v1351_v25 }
 0x180   :  { %v913_v30 = vpop.f32.mrf.mxu0  ;;  %v1060_v31 = vpop.f32.mrf.mxu1 }
 0x181   :  { %v1589_v34 = vadd.f32 %v2804_v6, %v1500_v29  ;;  %1855 = vmatmul.msk.f32.gmra.mxu2 %vm214_vm0, %v159_v27  ;;  %v1501_v35 = vmax.f32 %v913_v30, %v1060_v31  ;;  %1904 = vmatmul.msk.f32.gmra.mxu3 %vm214_vm0, %v208_v28 }
 0x183   :  { %v1638_v36 = vmax.f32 %v1589_v34, 0.0  ;;  %1757 = vmatmul.msk.f32.gmra.mxu0 %vm214_vm0, %v61_v32  ;;  %1806 = vmatmul.msk.f32.gmra.mxu1 %vm214_vm0, %v110_v33 }
 0x184   :  { %v1207_v37 = vpop.f32.mrf.mxu2  ;;  %v1354_v38 = vpop.f32.mrf.mxu3 }
 0x185   :  { %1687 = vst [vmem:[%s2945_s3 + $0xf0] sm:$0xff] %v1638_v36  ;;  %v1502_v39 = vmax.f32 %v1501_v35, %v1207_v37 }
 0x187   :  { %v1503_v42 = vmax.f32 %v1502_v39, %v1354_v38 }
 0x188   :  { %v916_v43 = vpop.f32.mrf.mxu0  ;;  %v1063_v44 = vpop.f32.mrf.mxu1 }
 0x189   :  { %v1590_v47 = vadd.f32 %v2804_v6, %v1503_v42  ;;  %1856 = vmatmul.msk.f32.gmra.mxu2 %vm214_vm0, %v160_v40  ;;  %v1504_v48 = vmax.f32 %v916_v43, %v1063_v44  ;;  %1905 = vmatmul.msk.f32.gmra.mxu3 %vm214_vm0, %v209_v41 }
 0x18b   :  { %v1639_v49 = vmax.f32 %v1590_v47, 0.0  ;;  %1758 = vmatmul.msk.f32.gmra.mxu0 %vm214_vm0, %v62_v45  ;;  %1807 = vmatmul.msk.f32.gmra.mxu1 %vm214_vm0, %v111_v46 }
 0x18c   :  { %v1210_v50 = vpop.f32.mrf.mxu2  ;;  %v1357_v51 = vpop.f32.mrf.mxu3 }
 0x18d   :  { %1688 = vst [vmem:[%s2945_s3 + $0xf8] sm:$0xff] %v1639_v49  ;;  %v1505_v52 = vmax.f32 %v1504_v48, %v1210_v50 }
 0x18f   :  { %v1506_v53 = vmax.f32 %v1505_v52, %v1357_v51 }
 0x190   :  { %v919_v54 = vpop.f32.mrf.mxu0  ;;  %v1066_v55 = vpop.f32.mrf.mxu1 }
 0x191   :  { %v1591_v56 = vadd.f32 %v2804_v6, %v1506_v53  ;;  %v1507_v57 = vmax.f32 %v919_v54, %v1066_v55 }
 0x193   :  { %v1640_v58 = vmax.f32 %v1591_v56, 0.0 }
 0x194   :  { %v1213_v59 = vpop.f32.mrf.mxu2  ;;  %v1360_v60 = vpop.f32.mrf.mxu3 }
 0x195   :  { %1689 = vst [vmem:[%s2945_s3 + $0x100] sm:$0xff] %v1640_v58  ;;  %v1508_v61 = vmax.f32 %v1507_v57, %v1213_v59 }
 0x197   :  { %v1509_v62 = vmax.f32 %v1508_v61, %v1360_v60 }
 0x198   :  { %v922_v63 = vpop.f32.mrf.mxu0  ;;  %v1069_v14 = vpop.f32.mrf.mxu1 }
 0x199   :  { %v1592_v0 = vadd.f32 %v2804_v6, %v1509_v62  ;;  %v1510_v1 = vmax.f32 %v922_v63, %v1069_v14 }
 0x19b   :  { %v1641_v2 = vmax.f32 %v1592_v0, 0.0 }
 0x19c   :  { %v1216_v3 = vpop.f32.mrf.mxu2  ;;  %v1363_v4 = vpop.f32.mrf.mxu3 }
 0x19d   :  { %1690 = vst [vmem:[%s2945_s3 + $0x108] sm:$0xff] %v1641_v2  ;;  %v1511_v5 = vmax.f32 %v1510_v1, %v1216_v3 }
 0x19f   :  { %v1512_v7 = vmax.f32 %v1511_v5, %v1363_v4 }
 0x1a0   :  { %v925_v8 = vpop.f32.mrf.mxu0  ;;  %v1072_v9 = vpop.f32.mrf.mxu1 }
 0x1a1   :  { %v1593_v10 = vadd.f32 %v2804_v6, %v1512_v7  ;;  %v1513_v11 = vmax.f32 %v925_v8, %v1072_v9 }
 0x1a3   :  { %v1642_v12 = vmax.f32 %v1593_v10, 0.0 }
 0x1a4   :  { %v1219_v13 = vpop.f32.mrf.mxu2  ;;  %v1366_v15 = vpop.f32.mrf.mxu3 }
 0x1a5   :  { %1691 = vst [vmem:[%s2945_s3 + $0x110] sm:$0xff] %v1642_v12  ;;  %v1514_v16 = vmax.f32 %v1513_v11, %v1219_v13 }
 0x1a7   :  { %v1515_v17 = vmax.f32 %v1514_v16, %v1366_v15 }
 0x1a8   :  { %v928_v18 = vpop.f32.mrf.mxu0  ;;  %v1075_v19 = vpop.f32.mrf.mxu1 }
 0x1a9   :  { %v1594_v20 = vadd.f32 %v2804_v6, %v1515_v17  ;;  %v1516_v21 = vmax.f32 %v928_v18, %v1075_v19 }
 0x1ab   :  { %v1643_v22 = vmax.f32 %v1594_v20, 0.0 }
 0x1ac   :  { %v1222_v23 = vpop.f32.mrf.mxu2  ;;  %v1369_v24 = vpop.f32.mrf.mxu3 }
 0x1ad   :  { %1692 = vst [vmem:[%s2945_s3 + $0x118] sm:$0xff] %v1643_v22  ;;  %v1517_v25 = vmax.f32 %v1516_v21, %v1222_v23 }
 0x1af   :  { %v1518_v26 = vmax.f32 %v1517_v25, %v1369_v24 }
 0x1b0   :  { %v931_v27 = vpop.f32.mrf.mxu0  ;;  %v1078_v28 = vpop.f32.mrf.mxu1 }
 0x1b1   :  { %v1595_v29 = vadd.f32 %v2804_v6, %v1518_v26  ;;  %v1519_v30 = vmax.f32 %v931_v27, %v1078_v28 }
 0x1b3   :  { %v1644_v31 = vmax.f32 %v1595_v29, 0.0 }
 0x1b4   :  { %v1225_v32 = vpop.f32.mrf.mxu2  ;;  %v1372_v33 = vpop.f32.mrf.mxu3 }
 0x1b5   :  { %1693 = vst [vmem:[%s2945_s3 + $0x120] sm:$0xff] %v1644_v31  ;;  %v1520_v34 = vmax.f32 %v1519_v30, %v1225_v32 }
 0x1b7   :  { %v1521_v35 = vmax.f32 %v1520_v34, %v1372_v33 }
 0x1b8   :  { %v934_v36 = vpop.f32.mrf.mxu0  ;;  %v1081_v37 = vpop.f32.mrf.mxu1 }
 0x1b9   :  { %v1596_v38 = vadd.f32 %v2804_v6, %v1521_v35  ;;  %v1522_v39 = vmax.f32 %v934_v36, %v1081_v37 }
 0x1bb   :  { %v1645_v40 = vmax.f32 %v1596_v38, 0.0 }
 0x1bc   :  { %v1228_v41 = vpop.f32.mrf.mxu2  ;;  %v1375_v42 = vpop.f32.mrf.mxu3 }
 0x1bd   :  { %1694 = vst [vmem:[%s2945_s3 + $0x128] sm:$0xff] %v1645_v40  ;;  %v1523_v43 = vmax.f32 %v1522_v39, %v1228_v41 }
 0x1bf   :  { %v1524_v44 = vmax.f32 %v1523_v43, %v1375_v42 }
 0x1c0   :  { %v937_v45 = vpop.f32.mrf.mxu0  ;;  %v1084_v46 = vpop.f32.mrf.mxu1 }
 0x1c1   :  { %v1597_v47 = vadd.f32 %v2804_v6, %v1524_v44  ;;  %v1525_v48 = vmax.f32 %v937_v45, %v1084_v46 }
 0x1c3   :  { %v1646_v49 = vmax.f32 %v1597_v47, 0.0 }
 0x1c4   :  { %v1231_v50 = vpop.f32.mrf.mxu2  ;;  %v1378_v51 = vpop.f32.mrf.mxu3 }
 0x1c5   :  { %1695 = vst [vmem:[%s2945_s3 + $0x130] sm:$0xff] %v1646_v49  ;;  %v1526_v52 = vmax.f32 %v1525_v48, %v1231_v50 }
 0x1c7   :  { %v1527_v53 = vmax.f32 %v1526_v52, %v1378_v51 }
 0x1c8   :  { %v940_v54 = vpop.f32.mrf.mxu0  ;;  %v1087_v55 = vpop.f32.mrf.mxu1 }
 0x1c9   :  { %v1598_v56 = vadd.f32 %v2804_v6, %v1527_v53  ;;  %v1528_v57 = vmax.f32 %v940_v54, %v1087_v55 }
 0x1cb   :  { %v1647_v58 = vmax.f32 %v1598_v56, 0.0 }
 0x1cc   :  { %v1234_v59 = vpop.f32.mrf.mxu2  ;;  %v1381_v60 = vpop.f32.mrf.mxu3 }
 0x1cd   :  { %1696 = vst [vmem:[%s2945_s3 + $0x138] sm:$0xff] %v1647_v58  ;;  %v1529_v61 = vmax.f32 %v1528_v57, %v1234_v59 }
 0x1cf   :  { %v1530_v62 = vmax.f32 %v1529_v61, %v1381_v60 }
 0x1d0   :  { %v943_v63 = vpop.f32.mrf.mxu0  ;;  %v1090_v14 = vpop.f32.mrf.mxu1 }
 0x1d1   :  { %v1599_v0 = vadd.f32 %v2804_v6, %v1530_v62  ;;  %v1531_v1 = vmax.f32 %v943_v63, %v1090_v14 }
 0x1d3   :  { %v1648_v2 = vmax.f32 %v1599_v0, 0.0 }
 0x1d4   :  { %v1237_v3 = vpop.f32.mrf.mxu2  ;;  %v1384_v4 = vpop.f32.mrf.mxu3 }
 0x1d5   :  { %1697 = vst [vmem:[%s2945_s3 + $0x140] sm:$0xff] %v1648_v2  ;;  %v1532_v5 = vmax.f32 %v1531_v1, %v1237_v3 }
 0x1d7   :  { %v1533_v7 = vmax.f32 %v1532_v5, %v1384_v4 }
 0x1d8   :  { %v946_v8 = vpop.f32.mrf.mxu0  ;;  %v1093_v9 = vpop.f32.mrf.mxu1 }
 0x1d9   :  { %v1600_v10 = vadd.f32 %v2804_v6, %v1533_v7  ;;  %v1534_v11 = vmax.f32 %v946_v8, %v1093_v9 }
 0x1db   :  { %v1649_v12 = vmax.f32 %v1600_v10, 0.0 }
 0x1dc   :  { %v1240_v13 = vpop.f32.mrf.mxu2  ;;  %v1387_v15 = vpop.f32.mrf.mxu3 }
 0x1dd   :  { %1698 = vst [vmem:[%s2945_s3 + $0x148] sm:$0xff] %v1649_v12  ;;  %v1535_v16 = vmax.f32 %v1534_v11, %v1240_v13 }
 0x1df   :  { %v1536_v17 = vmax.f32 %v1535_v16, %v1387_v15 }
 0x1e0   :  { %v949_v18 = vpop.f32.mrf.mxu0  ;;  %v1096_v19 = vpop.f32.mrf.mxu1 }
 0x1e1   :  { %v1601_v20 = vadd.f32 %v2804_v6, %v1536_v17  ;;  %v1537_v21 = vmax.f32 %v949_v18, %v1096_v19 }
 0x1e3   :  { %v1650_v22 = vmax.f32 %v1601_v20, 0.0 }
 0x1e4   :  { %v1243_v23 = vpop.f32.mrf.mxu2  ;;  %v1390_v24 = vpop.f32.mrf.mxu3 }
 0x1e5   :  { %1699 = vst [vmem:[%s2945_s3 + $0x150] sm:$0xff] %v1650_v22  ;;  %v1538_v25 = vmax.f32 %v1537_v21, %v1243_v23 }
 0x1e7   :  { %v1539_v26 = vmax.f32 %v1538_v25, %v1390_v24 }
 0x1e8   :  { %v952_v27 = vpop.f32.mrf.mxu0  ;;  %v1099_v28 = vpop.f32.mrf.mxu1 }
 0x1e9   :  { %v1602_v29 = vadd.f32 %v2804_v6, %v1539_v26  ;;  %v1540_v30 = vmax.f32 %v952_v27, %v1099_v28 }
 0x1eb   :  { %v1651_v31 = vmax.f32 %v1602_v29, 0.0 }
 0x1ec   :  { %v1246_v32 = vpop.f32.mrf.mxu2  ;;  %v1393_v33 = vpop.f32.mrf.mxu3 }
 0x1ed   :  { %1700 = vst [vmem:[%s2945_s3 + $0x158] sm:$0xff] %v1651_v31  ;;  %v1541_v34 = vmax.f32 %v1540_v30, %v1246_v32 }
 0x1ef   :  { %v1542_v35 = vmax.f32 %v1541_v34, %v1393_v33 }
 0x1f0   :  { %v955_v36 = vpop.f32.mrf.mxu0  ;;  %v1102_v37 = vpop.f32.mrf.mxu1 }
 0x1f1   :  { %v1603_v38 = vadd.f32 %v2804_v6, %v1542_v35  ;;  %v1543_v39 = vmax.f32 %v955_v36, %v1102_v37 }
 0x1f3   :  { %v1652_v40 = vmax.f32 %v1603_v38, 0.0 }
 0x1f4   :  { %v1249_v41 = vpop.f32.mrf.mxu2  ;;  %v1396_v42 = vpop.f32.mrf.mxu3 }
 0x1f5   :  { %1701 = vst [vmem:[%s2945_s3 + $0x160] sm:$0xff] %v1652_v40  ;;  %v1544_v43 = vmax.f32 %v1543_v39, %v1249_v41 }
 0x1f7   :  { %v1545_v44 = vmax.f32 %v1544_v43, %v1396_v42 }
 0x1f8   :  { %v958_v45 = vpop.f32.mrf.mxu0  ;;  %v1105_v46 = vpop.f32.mrf.mxu1 }
 0x1f9   :  { %v1604_v47 = vadd.f32 %v2804_v6, %v1545_v44  ;;  %v1546_v48 = vmax.f32 %v958_v45, %v1105_v46 }
 0x1fb   :  { %v1653_v49 = vmax.f32 %v1604_v47, 0.0 }
 0x1fc   :  { %v1252_v50 = vpop.f32.mrf.mxu2  ;;  %v1399_v51 = vpop.f32.mrf.mxu3 }
 0x1fd   :  { %1702 = vst [vmem:[%s2945_s3 + $0x168] sm:$0xff] %v1653_v49  ;;  %v1547_v52 = vmax.f32 %v1546_v48, %v1252_v50 }
 0x1ff   :  { %v1548_v53 = vmax.f32 %v1547_v52, %v1399_v51 }
 0x200   :  { %v961_v54 = vpop.f32.mrf.mxu0  ;;  %v1108_v55 = vpop.f32.mrf.mxu1 }
 0x201   :  { %v1605_v56 = vadd.f32 %v2804_v6, %v1548_v53  ;;  %v1549_v57 = vmax.f32 %v961_v54, %v1108_v55 }
 0x203   :  { %v1654_v58 = vmax.f32 %v1605_v56, 0.0 }
 0x204   :  { %v1255_v59 = vpop.f32.mrf.mxu2  ;;  %v1402_v60 = vpop.f32.mrf.mxu3 }
 0x205   :  { %1703 = vst [vmem:[%s2945_s3 + $0x170] sm:$0xff] %v1654_v58  ;;  %v1550_v61 = vmax.f32 %v1549_v57, %v1255_v59 }
 0x207   :  { %v1551_v62 = vmax.f32 %v1550_v61, %v1402_v60 }
 0x208   :  { %v964_v63 = vpop.f32.mrf.mxu0  ;;  %v1111_v14 = vpop.f32.mrf.mxu1 }
 0x209   :  { %v1606_v0 = vadd.f32 %v2804_v6, %v1551_v62  ;;  %v1552_v1 = vmax.f32 %v964_v63, %v1111_v14 }
 0x20b   :  { %v1655_v2 = vmax.f32 %v1606_v0, 0.0 }
 0x20c   :  { %v1258_v3 = vpop.f32.mrf.mxu2  ;;  %v1405_v4 = vpop.f32.mrf.mxu3 }
 0x20d   :  { %1704 = vst [vmem:[%s2945_s3 + $0x178] sm:$0xff] %v1655_v2  ;;  %v1553_v5 = vmax.f32 %v1552_v1, %v1258_v3 }
 0x20f   :  { %v1554_v7 = vmax.f32 %v1553_v5, %v1405_v4 }
 0x211   :  { %v1607_v8 = vadd.f32 %v2804_v6, %v1554_v7 }
 0x213   :  { %v1656_v9 = vmax.f32 %v1607_v8, 0.0 }
 0x215   :  { %1705 = vst [vmem:[%s2945_s3 + $0x180] sm:$0xff] %v1656_v9 }

// kernel: mcmc_lenet_forward.4
= control target key start
LH: loop header
LB: loop body
LE: loop exit
PB: predicated region body
PF: predicated region fallthrough
CT: control target
= control target key end

     0   :  { %vm89_vm0 = vcmask 195584   ;;  %s844_s1 = inlined_call_operand.vmem [shape: f32[152,128], index: 1, kind: input, shape index: {}]   ;;  %s845_s0 = inlined_call_operand.vmem [shape: f32[4,56,152], index: 0, kind: input, shape index: {}]   ;;  %s846_s2 = inlined_call_operand.vmem [shape: f32[1,128], index: 2, kind: input, shape index: {}]   ;;  %s847_s3 = inlined_call_operand.vmem [shape: f32[56,128], index: 3, kind: output, shape index: {}]  }
   0x1   :  { %v85_v0 = vld [vmem:[%s844_s1 + $0x78] sm:$0xff]  ;;  %v516_v1 = vld [vmem:[%s844_s1 + $0x90] sm:$0xff]  ;;  %v524_v3 = vld [vmem:[%s844_s1 + $0x88] sm:$0xff] }
   0x2   :  { %v84_v2 = vld [vmem:[%s844_s1 + $0x70] sm:$0xff]  ;;  %174 = vmatpush.msra.mxu0 %v85_v0  ;;  %454 = vmatpush.msra.mxu2 %v85_v0  ;;  %v83_v4 = vld [vmem:[%s844_s1 + $0x68] sm:$0xff]  ;;  %v533_v5 = vld [vmem:[%s844_s1 + $0x80] sm:$0xff] }
   0x3   :  { %455 = vmatpush.msra.mxu3 %v85_v0  ;;  %288 = vmatpush.msra.mxu1 %v516_v1  ;;  %v15_v6 = vld [vmem:[%s845_s0 + $0x8] sm:$0xff]  ;;  %v82_v7 = vld [vmem:[%s844_s1 + $0x60] sm:$0xff]  ;;  %v81_v8 = vld [vmem:[%s844_s1 + $0x58] sm:$0xff] }
   0x4   :  { %175 = vmatpush.msra.mxu0 %v84_v2  ;;  %456 = vmatpush.msra.mxu2 %v84_v2  ;;  %v80_v9 = vld [vmem:[%s844_s1 + $0x50] sm:$0xff]  ;;  %v79_v10 = vld [vmem:[%s844_s1 + $0x48] sm:$0xff]  ;;  %v17_v11 = vld [vmem:[%s845_s0 + $0x18] sm:$0xff] }
   0x5   :  { %457 = vmatpush.msra.mxu3 %v84_v2  ;;  %289 = vmatpush.msra.mxu1 %v524_v3  ;;  %v78_v12 = vld [vmem:[%s844_s1 + $0x40] sm:$0xff]  ;;  %v77_v13 = vld [vmem:[%s844_s1 + $0x38] sm:$0xff]  ;;  %v76_v14 = vld [vmem:[%s844_s1 + $0x30] sm:$0xff] }
   0x6   :  { %176 = vmatpush.msra.mxu0 %v83_v4  ;;  %458 = vmatpush.msra.mxu2 %v83_v4  ;;  %v75_v15 = vld [vmem:[%s844_s1 + $0x28] sm:$0xff]  ;;  %v74_v17 = vld [vmem:[%s844_s1 + $0x20] sm:$0xff]  ;;  %v73_v18 = vld [vmem:[%s844_s1 + $0x18] sm:$0xff] }
   0x7   :  { %459 = vmatpush.msra.mxu3 %v83_v4  ;;  %290 = vmatpush.msra.mxu1 %v533_v5  ;;  %v19_v16 = vld [vmem:[%s845_s0 + $0x28] sm:$0xff]  ;;  %v72_v19 = vld [vmem:[%s844_s1 + $0x10] sm:$0xff]  ;;  %v21_v21 = vld [vmem:[%s845_s0 + $0x38] sm:$0xff] }
   0x8   :  { %426 = vmatmul.msk.f32.vlgmr.msra.gmra.mxu1 %vm89_vm0, %v15_v6  ;;  %177 = vmatpush.msra.mxu0 %v82_v7  ;;  %v71_v20 = vld [vmem:[%s844_s1 + $0x8] sm:$0xff]  ;;  %v70_v22 = vld [vmem:[%s844_s1] sm:$0xff]  ;;  %v40_v24 = vld [vmem:[%s845_s0 + $0xd0] sm:$0xff] }
   0x9   :  { %460 = vmatpush.msra.mxu2 %v82_v7  ;;  %461 = vmatpush.msra.mxu3 %v82_v7  ;;  %v14_v23 = vld [vmem:[%s845_s0] sm:$0xff]  ;;  %v68_v25 = vld [vmem:[%s845_s0 + $0x1b0] sm:$0xff]  ;;  %v23_v26 = vld [vmem:[%s845_s0 + $0x48] sm:$0xff] }
   0xa   :  { %178 = vmatpush.msra.mxu0 %v81_v8  ;;  %v16_v27 = vld [vmem:[%s845_s0 + $0x10] sm:$0xff]  ;;  %v42_v28 = vld [vmem:[%s845_s0 + $0xe0] sm:$0xff]  ;;  %v47_v29 = vld [vmem:[%s845_s0 + $0x108] sm:$0xff] }
   0xb   :  { %462 = vmatpush.msra.mxu2 %v81_v8  ;;  %463 = vmatpush.msra.mxu3 %v81_v8  ;;  %v25_v30 = vld [vmem:[%s845_s0 + $0x58] sm:$0xff]  ;;  %v18_v31 = vld [vmem:[%s845_s0 + $0x20] sm:$0xff]  ;;  %v44_v32 = vld [vmem:[%s845_s0 + $0xf0] sm:$0xff] }
   0xc   :  { %179 = vmatpush.msra.mxu0 %v80_v9  ;;  %v49_v33 = vld [vmem:[%s845_s0 + $0x118] sm:$0xff]  ;;  %v27_v34 = vld [vmem:[%s845_s0 + $0x68] sm:$0xff]  ;;  %v20_v35 = vld [vmem:[%s845_s0 + $0x30] sm:$0xff] }
   0xd   :  { %464 = vmatpush.msra.mxu2 %v80_v9  ;;  %465 = vmatpush.msra.mxu3 %v80_v9  ;;  %v46_v36 = vld [vmem:[%s845_s0 + $0x100] sm:$0xff]  ;;  %v51_v37 = vld [vmem:[%s845_s0 + $0x128] sm:$0xff]  ;;  %v29_v38 = vld [vmem:[%s845_s0 + $0x78] sm:$0xff] }
   0xe   :  { %180 = vmatpush.msra.mxu0 %v79_v10  ;;  %v22_v39 = vld [vmem:[%s845_s0 + $0x40] sm:$0xff]  ;;  %v48_v40 = vld [vmem:[%s845_s0 + $0x110] sm:$0xff]  ;;  %v53_v41 = vld [vmem:[%s845_s0 + $0x138] sm:$0xff] }
   0xf   :  { %466 = vmatpush.msra.mxu2 %v79_v10  ;;  %467 = vmatpush.msra.mxu3 %v79_v10  ;;  %v31_v42 = vld [vmem:[%s845_s0 + $0x88] sm:$0xff]  ;;  %v24_v43 = vld [vmem:[%s845_s0 + $0x50] sm:$0xff]  ;;  %v50_v44 = vld [vmem:[%s845_s0 + $0x120] sm:$0xff] }
  0x10   :  { %427 = vmatmul.msk.f32.gmra.mxu1 %vm89_vm0, %v17_v11  ;;  %181 = vmatpush.msra.mxu0 %v78_v12  ;;  %v55_v45 = vld [vmem:[%s845_s0 + $0x148] sm:$0xff]  ;;  %v33_v46 = vld [vmem:[%s845_s0 + $0x98] sm:$0xff]  ;;  %v26_v47 = vld [vmem:[%s845_s0 + $0x60] sm:$0xff] }
  0x11   :  { %468 = vmatpush.msra.mxu2 %v78_v12  ;;  %469 = vmatpush.msra.mxu3 %v78_v12  ;;  %v52_v48 = vld [vmem:[%s845_s0 + $0x130] sm:$0xff]  ;;  %v57_v49 = vld [vmem:[%s845_s0 + $0x158] sm:$0xff]  ;;  %v35_v50 = vld [vmem:[%s845_s0 + $0xa8] sm:$0xff] }
  0x12   :  { %182 = vmatpush.msra.mxu0 %v77_v13  ;;  %v28_v51 = vld [vmem:[%s845_s0 + $0x70] sm:$0xff]  ;;  %v54_v52 = vld [vmem:[%s845_s0 + $0x140] sm:$0xff]  ;;  %v59_v53 = vld [vmem:[%s845_s0 + $0x168] sm:$0xff] }
  0x13   :  { %470 = vmatpush.msra.mxu2 %v77_v13  ;;  %471 = vmatpush.msra.mxu3 %v77_v13  ;;  %v37_v54 = vld [vmem:[%s845_s0 + $0xb8] sm:$0xff]  ;;  %v30_v55 = vld [vmem:[%s845_s0 + $0x80] sm:$0xff]  ;;  %v56_v56 = vld [vmem:[%s845_s0 + $0x150] sm:$0xff] }
  0x14   :  { %183 = vmatpush.msra.mxu0 %v76_v14  ;;  %v61_v57 = vld [vmem:[%s845_s0 + $0x178] sm:$0xff]  ;;  %v39_v58 = vld [vmem:[%s845_s0 + $0xc8] sm:$0xff]  ;;  %v32_v59 = vld [vmem:[%s845_s0 + $0x90] sm:$0xff] }
  0x15   :  { %472 = vmatpush.msra.mxu2 %v76_v14  ;;  %473 = vmatpush.msra.mxu3 %v76_v14  ;;  %v58_v60 = vld [vmem:[%s845_s0 + $0x160] sm:$0xff]  ;;  %v63_v61 = vld [vmem:[%s845_s0 + $0x188] sm:$0xff]  ;;  %v41_v62 = vld [vmem:[%s845_s0 + $0xd8] sm:$0xff] }
  0x16   :  { %184 = vmatpush.msra.mxu0 %v75_v15  ;;  %v34_v63 = vld [vmem:[%s845_s0 + $0xa0] sm:$0xff]  ;;  %v60_v0 = vld [vmem:[%s845_s0 + $0x170] sm:$0xff]  ;;  %v43_v2 = vld [vmem:[%s845_s0 + $0xe8] sm:$0xff] }
  0x17   :  { %474 = vmatpush.msra.mxu2 %v75_v15  ;;  %475 = vmatpush.msra.mxu3 %v75_v15  ;;  %v62_v4 = vld [vmem:[%s845_s0 + $0x180] sm:$0xff]  ;;  %v45_v6 = vld [vmem:[%s845_s0 + $0xf8] sm:$0xff]  ;;  %v64_v8 = vld [vmem:[%s845_s0 + $0x190] sm:$0xff] }
  0x18   :  { %428 = vmatmul.msk.f32.gmra.mxu1 %vm89_vm0, %v19_v16  ;;  %185 = vmatpush.msra.mxu0 %v74_v17  ;;  %v38_v7 = vld [vmem:[%s845_s0 + $0xc0] sm:$0xff]  ;;  %v69_v9 = vld [vmem:[%s845_s0 + $0x1b8] sm:$0xff] }
  0x19   :  { %476 = vmatpush.msra.mxu2 %v74_v17  ;;  %477 = vmatpush.msra.mxu3 %v74_v17  ;;  %v66_v11 = vld [vmem:[%s845_s0 + $0x1a0] sm:$0xff] }
  0x1a   :  { %186 = vmatpush.msra.mxu0 %v73_v18 }
  0x1b   :  { %478 = vmatpush.msra.mxu2 %v73_v18  ;;  %479 = vmatpush.msra.mxu3 %v73_v18 }
  0x1c   :  { %187 = vmatpush.msra.mxu0 %v72_v19 }
  0x1d   :  { %480 = vmatpush.msra.mxu2 %v72_v19  ;;  %481 = vmatpush.msra.mxu3 %v72_v19 }
  0x1e   :  { %188 = vmatpush.msra.mxu0 %v71_v20 }
  0x1f   :  { %482 = vmatpush.msra.mxu2 %v71_v20  ;;  %483 = vmatpush.msra.mxu3 %v71_v20 }
  0x20   :  { %429 = vmatmul.msk.f32.gmra.mxu1 %vm89_vm0, %v21_v21  ;;  %189 = vmatpush.msra.mxu0 %v70_v22 }
  0x21   :  { %484 = vmatpush.msra.mxu2 %v70_v22  ;;  %485 = vmatpush.msra.mxu3 %v70_v22 }
  0x22   :  { %190 = vmatmul.f32.vlgmr.msra.gmra.mxu0 %v14_v23  ;;  %229 = vmatmul.f32.vlgmr.msra.gmra.mxu2 %v40_v24 }
  0x23   :  { %271 = vmatmul.f32.vlgmr.msra.gmra.mxu3 %v68_v25 }
  0x24   :  { %486 = vmatpush.msrb.mxu3 %v516_v1  ;;  %v65_v1 = vld [vmem:[%s845_s0 + $0x198] sm:$0xff] }
  0x26   :  { %487 = vmatpush.msrb.mxu3 %v524_v3  ;;  %v36_v3 = vld [vmem:[%s845_s0 + $0xb0] sm:$0xff] }
  0x28   :  { %430 = vmatmul.msk.f32.gmra.mxu1 %vm89_vm0, %v23_v26  ;;  %488 = vmatpush.msrb.mxu3 %v533_v5  ;;  %v67_v5 = vld [vmem:[%s845_s0 + $0x1a8] sm:$0xff] }
  0x2a   :  { %193 = vmatmul.f32.gmra.mxu0 %v16_v27  ;;  %232 = vmatmul.f32.gmra.mxu2 %v42_v28 }
  0x2b   :  { %442 = vmatmul.msk.f32.vlgmr.msrb.gmra.mxu3 %vm89_vm0, %v47_v29 }
  0x30   :  { %431 = vmatmul.msk.f32.gmra.mxu1 %vm89_vm0, %v25_v30 }
  0x32   :  { %196 = vmatmul.f32.gmra.mxu0 %v18_v31  ;;  %235 = vmatmul.f32.gmra.mxu2 %v44_v32 }
  0x33   :  { %443 = vmatmul.msk.f32.gmra.mxu3 %vm89_vm0, %v49_v33 }
  0x38   :  { %432 = vmatmul.msk.f32.gmra.mxu1 %vm89_vm0, %v27_v34 }
  0x3a   :  { %199 = vmatmul.f32.gmra.mxu0 %v20_v35  ;;  %238 = vmatmul.f32.gmra.mxu2 %v46_v36 }
  0x3b   :  { %444 = vmatmul.msk.f32.gmra.mxu3 %vm89_vm0, %v51_v37 }
  0x40   :  { %433 = vmatmul.msk.f32.gmra.mxu1 %vm89_vm0, %v29_v38 }
  0x42   :  { %202 = vmatmul.f32.gmra.mxu0 %v22_v39  ;;  %241 = vmatmul.f32.gmra.mxu2 %v48_v40 }
  0x43   :  { %445 = vmatmul.msk.f32.gmra.mxu3 %vm89_vm0, %v53_v41 }
  0x48   :  { %434 = vmatmul.msk.f32.gmra.mxu1 %vm89_vm0, %v31_v42 }
  0x4a   :  { %205 = vmatmul.f32.gmra.mxu0 %v24_v43  ;;  %244 = vmatmul.f32.gmra.mxu2 %v50_v44 }
  0x4b   :  { %446 = vmatmul.msk.f32.gmra.mxu3 %vm89_vm0, %v55_v45 }
  0x50   :  { %435 = vmatmul.msk.f32.gmra.mxu1 %vm89_vm0, %v33_v46 }
  0x52   :  { %208 = vmatmul.f32.gmra.mxu0 %v26_v47  ;;  %247 = vmatmul.f32.gmra.mxu2 %v52_v48 }
  0x53   :  { %447 = vmatmul.msk.f32.gmra.mxu3 %vm89_vm0, %v57_v49 }
  0x58   :  { %436 = vmatmul.msk.f32.gmra.mxu1 %vm89_vm0, %v35_v50 }
  0x5a   :  { %211 = vmatmul.f32.gmra.mxu0 %v28_v51  ;;  %250 = vmatmul.f32.gmra.mxu2 %v54_v52 }
  0x5b   :  { %448 = vmatmul.msk.f32.gmra.mxu3 %vm89_vm0, %v59_v53 }
  0x60   :  { %437 = vmatmul.msk.f32.gmra.mxu1 %vm89_vm0, %v37_v54 }
  0x62   :  { %214 = vmatmul.f32.gmra.mxu0 %v30_v55  ;;  %253 = vmatmul.f32.gmra.mxu2 %v56_v56 }
  0x63   :  { %449 = vmatmul.msk.f32.gmra.mxu3 %vm89_vm0, %v61_v57 }
  0x68   :  { %438 = vmatmul.msk.f32.gmra.mxu1 %vm89_vm0, %v39_v58 }
  0x6a   :  { %217 = vmatmul.f32.gmra.mxu0 %v32_v59  ;;  %256 = vmatmul.f32.gmra.mxu2 %v58_v60 }
  0x6b   :  { %450 = vmatmul.msk.f32.gmra.mxu3 %vm89_vm0, %v63_v61 }
  0x70   :  { %439 = vmatmul.msk.f32.gmra.mxu1 %vm89_vm0, %v41_v62 }
  0x72   :  { %220 = vmatmul.f32.gmra.mxu0 %v34_v63  ;;  %259 = vmatmul.f32.gmra.mxu2 %v60_v0 }
  0x73   :  { %451 = vmatmul.msk.f32.gmra.mxu3 %vm89_vm0, %v65_v1 }
  0x78   :  { %440 = vmatmul.msk.f32.gmra.mxu1 %vm89_vm0, %v43_v2 }
  0x7a   :  { %223 = vmatmul.f32.gmra.mxu0 %v36_v3  ;;  %262 = vmatmul.f32.gmra.mxu2 %v62_v4 }
  0x7b   :  { %452 = vmatmul.msk.f32.gmra.mxu3 %vm89_vm0, %v67_v5 }
  0x80   :  { %441 = vmatmul.msk.f32.gmra.mxu1 %vm89_vm0, %v45_v6 }
  0x82   :  { %226 = vmatmul.f32.gmra.mxu0 %v38_v7  ;;  %265 = vmatmul.f32.gmra.mxu2 %v64_v8 }
  0x83   :  { %453 = vmatmul.msk.f32.gmra.mxu3 %vm89_vm0, %v69_v9  ;;  %v803_v9 = vld [vmem:[%s846_s2] ss:$0 sm:$0xff] }
  0x85   :  { %v292_v10 = vpop.f32.mrf.mxu1 }
  0x8a   :  { %268 = vmatmul.f32.gmra.mxu2 %v66_v11 }
  0x8d   :  { %v295_v12 = vpop.f32.mrf.mxu1 }
  0x95   :  { %v298_v13 = vpop.f32.mrf.mxu1 }
  0x9d   :  { %v301_v14 = vpop.f32.mrf.mxu1 }
  0x9f   :  { %v191_v15 = vpop.f32.mrf.mxu0 }
  0xa0   :  { %v775_v16 = vadd.f32 %v292_v10, %v191_v15 }
  0xa5   :  { %v777_v17 = vpop.f32.mrf.mxu2  ;;  %v304_v18 = vpop.f32.mrf.mxu1 }
  0xa6   :  { %v779_v19 = vpop.f32.mrf.mxu3 }
  0xa7   :  { %v194_v20 = vpop.f32.mrf.mxu0 }
  0xa8   :  { %v781_v21 = vadd.f32 %v295_v12, %v194_v20 }
  0xad   :  { %v233_v22 = vpop.f32.mrf.mxu2  ;;  %v783_v23 = vpop.f32.mrf.mxu1 }
  0xae   :  { %v340_v24 = vpop.f32.mrf.mxu3 }
  0xaf   :  { %v197_v25 = vpop.f32.mrf.mxu0 }
  0xb0   :  { %v299_v54 = vadd.f32 %v298_v13, %v197_v25 }
  0xb5   :  { %v785_v26 = vpop.f32.mrf.mxu2  ;;  %v787_v27 = vpop.f32.mrf.mxu1 }
  0xb6   :  { %v343_v28 = vpop.f32.mrf.mxu3 }
  0xb7   :  { %v200_v29 = vpop.f32.mrf.mxu0 }
  0xb8   :  { %v302_v63 = vadd.f32 %v301_v14, %v200_v29 }
  0xbd   :  { %v239_v30 = vpop.f32.mrf.mxu2  ;;  %v313_v31 = vpop.f32.mrf.mxu1 }
  0xbe   :  { %v346_v32 = vpop.f32.mrf.mxu3  ;;  %v341_v56 = vadd.f32 %v340_v24, %v239_v30 }
  0xbf   :  { %v203_v33 = vpop.f32.mrf.mxu0 }
  0xc0   :  { %v305_v12 = vadd.f32 %v304_v18, %v203_v33 }
  0xc5   :  { %v242_v34 = vpop.f32.mrf.mxu2  ;;  %v316_v35 = vpop.f32.mrf.mxu1 }
  0xc6   :  { %v789_v36 = vpop.f32.mrf.mxu3  ;;  %v344_v1 = vadd.f32 %v343_v28, %v242_v34 }
  0xc7   :  { %v206_v37 = vpop.f32.mrf.mxu0 }
  0xcd   :  { %v245_v38 = vpop.f32.mrf.mxu2  ;;  %v319_v39 = vpop.f32.mrf.mxu1 }
  0xce   :  { %v791_v40 = vpop.f32.mrf.mxu3  ;;  %v347_v25 = vadd.f32 %v346_v32, %v245_v38  ;;  %v308_v38 = vadd.f32 %v783_v23, %v206_v37 }
  0xcf   :  { %v793_v41 = vpop.f32.mrf.mxu0 }
  0xd5   :  { %v795_v42 = vpop.f32.mrf.mxu2  ;;  %v322_v43 = vpop.f32.mrf.mxu1 }
  0xd6   :  { %v355_v44 = vpop.f32.mrf.mxu3 }
  0xd7   :  { %v212_v45 = vpop.f32.mrf.mxu0 }
  0xd8   :  { %v314_v2 = vadd.f32 %v313_v31, %v212_v45 }
  0xda   :  { %v376_v7 = vmax.f32 %v775_v16, %v314_v2 }
  0xdd   :  { %v797_v46 = vpop.f32.mrf.mxu2  ;;  %v325_v47 = vpop.f32.mrf.mxu1 }
  0xde   :  { %v358_v48 = vpop.f32.mrf.mxu3 }
  0xdf   :  { %v215_v49 = vpop.f32.mrf.mxu0 }
  0xe0   :  { %v317_v28 = vadd.f32 %v316_v35, %v215_v49 }
  0xe5   :  { %v254_v50 = vpop.f32.mrf.mxu2  ;;  %v328_v51 = vpop.f32.mrf.mxu1 }
  0xe6   :  { %v361_v52 = vpop.f32.mrf.mxu3  ;;  %v356_v14 = vadd.f32 %v355_v44, %v254_v50 }
  0xe7   :  { %v218_v53 = vpop.f32.mrf.mxu0 }
  0xe8   :  { %v320_v55 = vadd.f32 %v319_v39, %v218_v53  ;;  %v311_v53 = vadd.f32 %v787_v27, %v793_v41 }
  0xea   :  { %v382_v57 = vmax.f32 %v299_v54, %v320_v55 }
  0xec   :  { %v383_v58 = vmax.f32 %v382_v57, %v341_v56  ;;  %v353_v57 = vadd.f32 %v791_v40, %v797_v46 }
  0xed   :  { %v257_v59 = vpop.f32.mrf.mxu2  ;;  %v331_v60 = vpop.f32.mrf.mxu1 }
  0xee   :  { %v364_v61 = vpop.f32.mrf.mxu3  ;;  %v332_v44 = vadd.f32 %v331_v60, %v777_v17  ;;  %v359_v49 = vadd.f32 %v358_v48, %v257_v59 }
  0xef   :  { %v221_v62 = vpop.f32.mrf.mxu0 }
  0xf0   :  { %v323_v0 = vadd.f32 %v322_v43, %v221_v62  ;;  %v394_v17 = vmax.f32 %v311_v53, %v332_v44 }
  0xf2   :  { %v385_v3 = vmax.f32 %v302_v63, %v323_v0 }
  0xf4   :  { %v386_v4 = vmax.f32 %v385_v3, %v344_v1 }
  0xf5   :  { %v260_v5 = vpop.f32.mrf.mxu2  ;;  %v334_v6 = vpop.f32.mrf.mxu1 }
  0xf6   :  { %v362_v8 = vadd.f32 %v361_v52, %v260_v5  ;;  %v335_v10 = vadd.f32 %v334_v6, %v233_v22  ;;  %v367_v11 = vpop.f32.mrf.mxu3  ;;  %v379_v22 = vmax.f32 %v781_v21, %v317_v28 }
  0xf7   :  { %v224_v13 = vpop.f32.mrf.mxu0 }
  0xf8   :  { %v384_v15 = vmax.f32 %v383_v58, %v362_v8  ;;  %v377_v20 = vmax.f32 %v376_v7, %v335_v10  ;;  %v326_v24 = vadd.f32 %v325_v47, %v224_v13 }
  0xfa   :  { %v403_v29 = vadd.f32 %v803_v9, %v384_v15  ;;  %v378_v30 = vmax.f32 %v377_v20, %v356_v14  ;;  %v388_v16 = vmax.f32 %v305_v12, %v326_v24 }
  0xfc   :  { %v410_v31 = vmax.f32 %v403_v29, 0.0  ;;  %v401_v34 = vadd.f32 %v803_v9, %v378_v30  ;;  %v389_v39 = vmax.f32 %v388_v16, %v347_v25 }
  0xfd   :  { %v263_v43 = vpop.f32.mrf.mxu2  ;;  %v337_v45 = vpop.f32.mrf.mxu1 }
  0xfe   :  { %417 = vst [vmem:[%s847_s3 + $0x10] sm:$0xff] %v410_v31  ;;  %v408_v18 = vmax.f32 %v401_v34, 0.0  ;;  %v365_v33 = vadd.f32 %v364_v61, %v263_v43  ;;  %v338_v32 = vadd.f32 %v337_v45, %v785_v26  ;;  %v370_v35 = vpop.f32.mrf.mxu3  ;;  %v350_v26 = vadd.f32 %v789_v36, %v795_v42 }
  0xff   :  { %v227_v47 = vpop.f32.mrf.mxu0 }
 0x100   :  { %415 = vst [vmem:[%s847_s3] sm:$0xff] %v408_v18  ;;  %v387_v21 = vmax.f32 %v386_v4, %v365_v33  ;;  %v380_v50 = vmax.f32 %v379_v22, %v338_v32  ;;  %v329_v52 = vadd.f32 %v328_v51, %v227_v47  ;;  %v395_v51 = vmax.f32 %v394_v17, %v353_v57 }
 0x102   :  { %v404_v54 = vadd.f32 %v803_v9, %v387_v21  ;;  %v381_v23 = vmax.f32 %v380_v50, %v359_v49  ;;  %v391_v37 = vmax.f32 %v308_v38, %v329_v52 }
 0x104   :  { %v411_v55 = vmax.f32 %v404_v54, 0.0  ;;  %v402_v48 = vadd.f32 %v803_v9, %v381_v23  ;;  %v392_v56 = vmax.f32 %v391_v37, %v350_v26 }
 0x105   :  { %v266_v58 = vpop.f32.mrf.mxu2 }
 0x106   :  { %418 = vst [vmem:[%s847_s3 + $0x18] sm:$0xff] %v411_v55  ;;  %v409_v27 = vmax.f32 %v402_v48, 0.0  ;;  %v368_v41 = vadd.f32 %v367_v11, %v266_v58  ;;  %v373_v36 = vpop.f32.mrf.mxu3 }
 0x107   :  { %v374_v42 = vadd.f32 %v373_v36, %v779_v19 }
 0x108   :  { %416 = vst [vmem:[%s847_s3 + $0x8] sm:$0xff] %v409_v27  ;;  %v390_v59 = vmax.f32 %v389_v39, %v368_v41 }
 0x109   :  { %v396_v60 = vmax.f32 %v395_v51, %v374_v42 }
 0x10a   :  { %v405_v61 = vadd.f32 %v803_v9, %v390_v59 }
 0x10b   :  { %v407_v40 = vadd.f32 %v803_v9, %v396_v60 }
 0x10c   :  { %v412_v46 = vmax.f32 %v405_v61, 0.0 }
 0x10d   :  { %v414_v62 = vmax.f32 %v407_v40, 0.0  ;;  %v269_v63 = vpop.f32.mrf.mxu2 }
 0x10e   :  { %419 = vst [vmem:[%s847_s3 + $0x20] sm:$0xff] %v412_v46  ;;  %v371_v0 = vadd.f32 %v370_v35, %v269_v63 }
 0x10f   :  { %421 = vst [vmem:[%s847_s3 + $0x30] sm:$0xff] %v414_v62 }
 0x110   :  { %v393_v19 = vmax.f32 %v392_v56, %v371_v0 }
 0x112   :  { %v406_v1 = vadd.f32 %v803_v9, %v393_v19 }
 0x114   :  { %v413_v2 = vmax.f32 %v406_v1, 0.0 }
 0x116   :  { %420 = vst [vmem:[%s847_s3 + $0x28] sm:$0xff] %v413_v2 }

// kernel: mcmc_lenet_forward.5
= control target key start
LH: loop header
LB: loop body
LE: loop exit
PB: predicated region body
PF: predicated region fallthrough
CT: control target
= control target key end

     0   :  { %vm84_vm0 = vcmask 130048   ;;  %s569_s1 = inlined_call_operand.vmem [shape: f32[400,128], index: 1, kind: input, shape index: {}]   ;;  %s570_s0 = inlined_call_operand.vmem [shape: f32[8,400], index: 0, kind: input, shape index: {}]   ;;  %s571_s3 = inlined_call_operand.vmem [shape: f32[128,128], index: 3, kind: input, shape index: {}]   ;;  %s572_s2 = inlined_call_operand.vmem [shape: f32[1,128], index: 2, kind: input, shape index: {}]   ;;  %s573_s4 = inlined_call_operand.vmem [shape: f32[1,128], index: 4, kind: input, shape index: {}]   ;;  %s574_s5 = inlined_call_operand.vmem [shape: f32[128,128], index: 5, kind: input, shape index: {}]   ;;  %s575_s6 = inlined_call_operand.vmem [shape: f32[1,128], index: 6, kind: input, shape index: {}]   ;;  %s576_s7 = inlined_call_operand.vmem [shape: f32[8,128], index: 7, kind: output, shape index: {}]  }
   0x1   :  { %v77_v0 = vld [vmem:[%s569_s1 + $0x178] sm:$0xff]  ;;  %v76_v2 = vld [vmem:[%s569_s1 + $0x170] sm:$0xff]  ;;  %v75_v5 = vld [vmem:[%s569_s1 + $0x168] sm:$0xff] }
   0x2   :  { %v45_v1 = vld [vmem:[%s569_s1 + $0x78] sm:$0xff]  ;;  %128 = vmatpush.msra.mxu2 %v77_v0  ;;  %v44_v3 = vld [vmem:[%s569_s1 + $0x70] sm:$0xff]  ;;  %v43_v6 = vld [vmem:[%s569_s1 + $0x68] sm:$0xff] }
   0x3   :  { %88 = vmatpush.msra.mxu0 %v45_v1  ;;  %v61_v4 = vld [vmem:[%s569_s1 + $0xf8] sm:$0xff]  ;;  %v60_v7 = vld [vmem:[%s569_s1 + $0xf0] sm:$0xff]  ;;  %v59_v8 = vld [vmem:[%s569_s1 + $0xe8] sm:$0xff] }
   0x4   :  { %108 = vmatpush.msra.mxu1 %v61_v4  ;;  %129 = vmatpush.msra.mxu2 %v76_v2  ;;  %v74_v9 = vld [vmem:[%s569_s1 + $0x160] sm:$0xff]  ;;  %v73_v12 = vld [vmem:[%s569_s1 + $0x158] sm:$0xff]  ;;  %v72_v15 = vld [vmem:[%s569_s1 + $0x150] sm:$0xff] }
   0x5   :  { %89 = vmatpush.msra.mxu0 %v44_v3  ;;  %v42_v10 = vld [vmem:[%s569_s1 + $0x60] sm:$0xff]  ;;  %v41_v13 = vld [vmem:[%s569_s1 + $0x58] sm:$0xff]  ;;  %v40_v16 = vld [vmem:[%s569_s1 + $0x50] sm:$0xff] }
   0x6   :  { %109 = vmatpush.msra.mxu1 %v60_v7  ;;  %130 = vmatpush.msra.mxu2 %v75_v5  ;;  %v58_v11 = vld [vmem:[%s569_s1 + $0xe0] sm:$0xff]  ;;  %v57_v14 = vld [vmem:[%s569_s1 + $0xd8] sm:$0xff]  ;;  %v56_v17 = vld [vmem:[%s569_s1 + $0xd0] sm:$0xff] }
   0x7   :  { %90 = vmatpush.msra.mxu0 %v43_v6  ;;  %v71_v18 = vld [vmem:[%s569_s1 + $0x148] sm:$0xff]  ;;  %v70_v21 = vld [vmem:[%s569_s1 + $0x140] sm:$0xff]  ;;  %v69_v24 = vld [vmem:[%s569_s1 + $0x138] sm:$0xff] }
   0x8   :  { %110 = vmatpush.msra.mxu1 %v59_v8  ;;  %131 = vmatpush.msra.mxu2 %v74_v9  ;;  %v39_v19 = vld [vmem:[%s569_s1 + $0x48] sm:$0xff]  ;;  %v38_v22 = vld [vmem:[%s569_s1 + $0x40] sm:$0xff]  ;;  %v37_v25 = vld [vmem:[%s569_s1 + $0x38] sm:$0xff] }
   0x9   :  { %91 = vmatpush.msra.mxu0 %v42_v10  ;;  %v55_v20 = vld [vmem:[%s569_s1 + $0xc8] sm:$0xff]  ;;  %v54_v23 = vld [vmem:[%s569_s1 + $0xc0] sm:$0xff]  ;;  %v53_v26 = vld [vmem:[%s569_s1 + $0xb8] sm:$0xff] }
   0xa   :  { %111 = vmatpush.msra.mxu1 %v58_v11  ;;  %132 = vmatpush.msra.mxu2 %v73_v12  ;;  %v79_v27 = vld [vmem:[%s569_s1 + $0x188] sm:$0xff]  ;;  %v68_v28 = vld [vmem:[%s569_s1 + $0x130] sm:$0xff]  ;;  %v78_v30 = vld [vmem:[%s569_s1 + $0x180] sm:$0xff] }
   0xb   :  { %92 = vmatpush.msra.mxu0 %v41_v13  ;;  %v36_v29 = vld [vmem:[%s569_s1 + $0x30] sm:$0xff]  ;;  %162 = vmatpush.msra.mxu3 %v79_v27  ;;  %v29_v32 = vld [vmem:[%s570_s0 + $0x18] sm:$0xff]  ;;  %v67_v33 = vld [vmem:[%s569_s1 + $0x128] sm:$0xff] }
   0xc   :  { %112 = vmatpush.msra.mxu1 %v57_v14  ;;  %133 = vmatpush.msra.mxu2 %v72_v15  ;;  %v52_v31 = vld [vmem:[%s569_s1 + $0xb0] sm:$0xff]  ;;  %v35_v34 = vld [vmem:[%s569_s1 + $0x28] sm:$0xff]  ;;  %v184_v36 = vld [vmem:[%s571_s3 + $0x78] sm:$0xff] }
   0xd   :  { %93 = vmatpush.msra.mxu0 %v40_v16  ;;  %163 = vmatpush.msra.mxu3 %v78_v30  ;;  %v51_v35 = vld [vmem:[%s569_s1 + $0xa8] sm:$0xff]  ;;  %v66_v37 = vld [vmem:[%s569_s1 + $0x120] sm:$0xff]  ;;  %v183_v40 = vld [vmem:[%s571_s3 + $0x70] sm:$0xff] }
   0xe   :  { %113 = vmatpush.msra.mxu1 %v56_v17  ;;  %134 = vmatpush.msra.mxu2 %v71_v18  ;;  %v34_v38 = vld [vmem:[%s569_s1 + $0x20] sm:$0xff]  ;;  %v65_v41 = vld [vmem:[%s569_s1 + $0x118] sm:$0xff]  ;;  %v182_v44 = vld [vmem:[%s571_s3 + $0x68] sm:$0xff] }
   0xf   :  { %94 = vmatpush.msra.mxu0 %v39_v19  ;;  %255 = vmatmul.msk.f32.vlgmr.msra.gmra.mxu3 %vm84_vm0, %v29_v32  ;;  %v50_v39 = vld [vmem:[%s569_s1 + $0xa0] sm:$0xff]  ;;  %v33_v42 = vld [vmem:[%s569_s1 + $0x18] sm:$0xff]  ;;  %v64_v45 = vld [vmem:[%s569_s1 + $0x110] sm:$0xff] }
  0x10   :  { %114 = vmatpush.msra.mxu1 %v55_v20  ;;  %135 = vmatpush.msra.mxu2 %v70_v21  ;;  %v49_v43 = vld [vmem:[%s569_s1 + $0x98] sm:$0xff]  ;;  %v32_v46 = vld [vmem:[%s569_s1 + $0x10] sm:$0xff]  ;;  %v181_v48 = vld [vmem:[%s571_s3 + $0x60] sm:$0xff] }
  0x11   :  { %95 = vmatpush.msra.mxu0 %v38_v22  ;;  %189 = vmatpush.msrb.mxu3 %v184_v36  ;;  %v48_v47 = vld [vmem:[%s569_s1 + $0x90] sm:$0xff]  ;;  %v63_v49 = vld [vmem:[%s569_s1 + $0x108] sm:$0xff]  ;;  %v180_v52 = vld [vmem:[%s571_s3 + $0x58] sm:$0xff] }
  0x12   :  { %115 = vmatpush.msra.mxu1 %v54_v23  ;;  %136 = vmatpush.msra.mxu2 %v69_v24  ;;  %v31_v50 = vld [vmem:[%s569_s1 + $0x8] sm:$0xff]  ;;  %v62_v53 = vld [vmem:[%s569_s1 + $0x100] sm:$0xff]  ;;  %v28_v55 = vld [vmem:[%s570_s0 + $0x10] sm:$0xff] }
  0x13   :  { %96 = vmatpush.msra.mxu0 %v37_v25  ;;  %190 = vmatpush.msrb.mxu3 %v183_v40  ;;  %v47_v51 = vld [vmem:[%s569_s1 + $0x88] sm:$0xff]  ;;  %v30_v54 = vld [vmem:[%s569_s1] sm:$0xff]  ;;  %v179_v58 = vld [vmem:[%s571_s3 + $0x50] sm:$0xff] }
  0x14   :  { %116 = vmatpush.msra.mxu1 %v53_v26  ;;  %137 = vmatpush.msra.mxu2 %v68_v28  ;;  %v26_v56 = vld [vmem:[%s570_s0] sm:$0xff]  ;;  %v27_v59 = vld [vmem:[%s570_s0 + $0x8] sm:$0xff]  ;;  %v176_v62 = vld [vmem:[%s571_s3 + $0x38] sm:$0xff] }
  0x15   :  { %97 = vmatpush.msra.mxu0 %v36_v29  ;;  %191 = vmatpush.msrb.mxu3 %v182_v44  ;;  %v46_v57 = vld [vmem:[%s569_s1 + $0x80] sm:$0xff]  ;;  %v178_v60 = vld [vmem:[%s571_s3 + $0x48] sm:$0xff]  ;;  %v175_v63 = vld [vmem:[%s571_s3 + $0x30] sm:$0xff] }
  0x16   :  { %117 = vmatpush.msra.mxu1 %v52_v31  ;;  %138 = vmatpush.msra.mxu2 %v67_v33  ;;  %v177_v61 = vld [vmem:[%s571_s3 + $0x40] sm:$0xff]  ;;  %v174_v0 = vld [vmem:[%s571_s3 + $0x28] sm:$0xff]  ;;  %v172_v2 = vld [vmem:[%s571_s3 + $0x18] sm:$0xff] }
  0x17   :  { %98 = vmatpush.msra.mxu0 %v35_v34  ;;  %192 = vmatpush.msrb.mxu3 %v181_v48  ;;  %v173_v1 = vld [vmem:[%s571_s3 + $0x20] sm:$0xff]  ;;  %v171_v3 = vld [vmem:[%s571_s3 + $0x10] sm:$0xff]  ;;  %v170_v4 = vld [vmem:[%s571_s3 + $0x8] sm:$0xff] }
  0x18   :  { %118 = vmatpush.msra.mxu1 %v51_v35  ;;  %139 = vmatpush.msra.mxu2 %v66_v37  ;;  %v169_v5 = vld [vmem:[%s571_s3] sm:$0xff]  ;;  %v225_v6 = vld [vmem:[%s574_s5 + $0x78] sm:$0xff]  ;;  %v224_v7 = vld [vmem:[%s574_s5 + $0x70] sm:$0xff] }
  0x19   :  { %99 = vmatpush.msra.mxu0 %v34_v38  ;;  %193 = vmatpush.msrb.mxu3 %v180_v52  ;;  %v223_v8 = vld [vmem:[%s574_s5 + $0x68] sm:$0xff]  ;;  %v222_v9 = vld [vmem:[%s574_s5 + $0x60] sm:$0xff]  ;;  %v221_v10 = vld [vmem:[%s574_s5 + $0x58] sm:$0xff] }
  0x1a   :  { %119 = vmatpush.msra.mxu1 %v50_v39  ;;  %140 = vmatpush.msra.mxu2 %v65_v41  ;;  %v220_v11 = vld [vmem:[%s574_s5 + $0x50] sm:$0xff]  ;;  %v219_v12 = vld [vmem:[%s574_s5 + $0x48] sm:$0xff]  ;;  %v218_v13 = vld [vmem:[%s574_s5 + $0x40] sm:$0xff] }
  0x1b   :  { %100 = vmatpush.msra.mxu0 %v33_v42  ;;  %194 = vmatpush.msrb.mxu3 %v179_v58  ;;  %v217_v14 = vld [vmem:[%s574_s5 + $0x38] sm:$0xff]  ;;  %v256_v15 = vld [vmem:[%s572_s2] ss:$0 sm:$0xff]  ;;  %v216_v16 = vld [vmem:[%s574_s5 + $0x30] sm:$0xff] }
  0x1c   :  { %120 = vmatpush.msra.mxu1 %v49_v43  ;;  %141 = vmatpush.msra.mxu2 %v64_v45  ;;  %v215_v17 = vld [vmem:[%s574_s5 + $0x28] sm:$0xff]  ;;  %v214_v20 = vld [vmem:[%s574_s5 + $0x20] sm:$0xff]  ;;  %v213_v23 = vld [vmem:[%s574_s5 + $0x18] sm:$0xff] }
  0x1d   :  { %101 = vmatpush.msra.mxu0 %v32_v46  ;;  %195 = vmatpush.msrb.mxu3 %v178_v60  ;;  %v212_v29 = vld [vmem:[%s574_s5 + $0x10] sm:$0xff]  ;;  %v211_v30 = vld [vmem:[%s574_s5 + $0x8] sm:$0xff]  ;;  %v210_v31 = vld [vmem:[%s574_s5] sm:$0xff] }
  0x1e   :  { %121 = vmatpush.msra.mxu1 %v48_v47  ;;  %142 = vmatpush.msra.mxu2 %v63_v49  ;;  %v257_v32 = vld [vmem:[%s573_s4] ss:$0 sm:$0xff] }
  0x1f   :  { %102 = vmatpush.msra.mxu0 %v31_v50  ;;  %196 = vmatpush.msrb.mxu3 %v177_v61  ;;  %v258_v36 = vld [vmem:[%s575_s6] ss:$0 sm:$0xff] }
  0x20   :  { %122 = vmatpush.msra.mxu1 %v47_v51  ;;  %143 = vmatpush.msra.mxu2 %v62_v53 }
  0x21   :  { %103 = vmatpush.msra.mxu0 %v30_v54  ;;  %144 = vmatmul.f32.vlgmr.msra.gmra.mxu2 %v28_v55 }
  0x22   :  { %104 = vmatmul.f32.vlgmr.msra.gmra.mxu0 %v26_v56  ;;  %123 = vmatpush.msra.mxu1 %v46_v57 }
  0x23   :  { %124 = vmatmul.f32.vlgmr.msra.gmra.mxu1 %v27_v59  ;;  %197 = vmatpush.msrb.mxu3 %v176_v62 }
  0x24   :  { %230 = vmatpush.msrb.mxu0 %v225_v6 }
  0x25   :  { %198 = vmatpush.msrb.mxu3 %v175_v63 }
  0x26   :  { %231 = vmatpush.msrb.mxu0 %v224_v7 }
  0x27   :  { %199 = vmatpush.msrb.mxu3 %v174_v0 }
  0x28   :  { %232 = vmatpush.msrb.mxu0 %v223_v8 }
  0x29   :  { %200 = vmatpush.msrb.mxu3 %v173_v1 }
  0x2a   :  { %233 = vmatpush.msrb.mxu0 %v222_v9 }
  0x2b   :  { %201 = vmatpush.msrb.mxu3 %v172_v2 }
  0x2c   :  { %234 = vmatpush.msrb.mxu0 %v221_v10 }
  0x2d   :  { %202 = vmatpush.msrb.mxu3 %v171_v3 }
  0x2e   :  { %235 = vmatpush.msrb.mxu0 %v220_v11 }
  0x2f   :  { %203 = vmatpush.msrb.mxu3 %v170_v4 }
  0x30   :  { %236 = vmatpush.msrb.mxu0 %v219_v12 }
  0x31   :  { %204 = vmatpush.msrb.mxu3 %v169_v5 }
  0x32   :  { %237 = vmatpush.msrb.mxu0 %v218_v13 }
  0x34   :  { %238 = vmatpush.msrb.mxu0 %v217_v14 }
  0x36   :  { %239 = vmatpush.msrb.mxu0 %v216_v16 }
  0x38   :  { %240 = vmatpush.msrb.mxu0 %v215_v17 }
  0x3a   :  { %241 = vmatpush.msrb.mxu0 %v214_v20 }
  0x3c   :  { %242 = vmatpush.msrb.mxu0 %v213_v23 }
  0x3e   :  { %243 = vmatpush.msrb.mxu0 %v212_v29 }
  0x40   :  { %244 = vmatpush.msrb.mxu0 %v211_v30 }
  0x42   :  { %245 = vmatpush.msrb.mxu0 %v210_v31 }
  0x92   :  { %v165_v25 = vpop.f32.mrf.mxu3 }
  0x9f   :  { %v105_v18 = vpop.f32.mrf.mxu0 }
  0xa0   :  { %v106_v19 = vadd.f32 %v256_v15, %v105_v18  ;;  %v125_v21 = vpop.f32.mrf.mxu1 }
  0xa2   :  { %v126_v22 = vadd.f32 %v125_v21, %v106_v19 }
  0xa4   :  { %v145_v24 = vpop.f32.mrf.mxu2 }
  0xa5   :  { %v146_v26 = vadd.f32 %v145_v24, %v126_v22 }
  0xa7   :  { %v166_v27 = vadd.f32 %v165_v25, %v146_v26 }
  0xa9   :  { %v168_v28 = vmax.f32 %v166_v27, 0.0 }
  0xab   :  { %205 = vmatmul.f32.vlgmr.msrb.gmra.mxu3 %v168_v28 }
 0x12e   :  { %v206_v33 = vpop.f32.mrf.mxu3 }
 0x12f   :  { %v207_v34 = vadd.f32 %v257_v32, %v206_v33 }
 0x131   :  { %v209_v35 = vmax.f32 %v207_v34, 0.0 }
 0x133   :  { %246 = vmatmul.f32.vlgmr.msrb.gmra.mxu0 %v209_v35 }
 0x1b0   :  { %v247_v37 = vpop.f32.mrf.mxu0 }
 0x1b1   :  { %v248_v38 = vadd.f32 %v258_v36, %v247_v37 }
 0x1b3   :  { %250 = vst [vmem:[%s576_s7] sm:$0xff] %v248_v38 }

</bundles_post_ra>
